<compile_context>
chip_gen: v6e
topology: v6e:2x2x1
jax: 0.10.0
libtpu: 0.0.40
codegen_flags: <defaults>
</compile_context>

<pallas_src>
import functools

import jax
import jax.numpy as jnp
from jax.experimental import pallas as pl
from jax.experimental.pallas import tpu as pltpu

EPS = 1e-5


# ----------------------------------------------------------------------------
# Small helpers
# ----------------------------------------------------------------------------
def _round_up(x, m):
    return ((x + m - 1) // m) * m


def _spec(block_shape, index_map, *, single_buffer=False):
    """BlockSpec; grid-invariant operands get one VMEM buffer when supported."""
    if single_buffer and hasattr(pl, "Buffered"):
        try:
            return pl.BlockSpec(block_shape, index_map,
                                pipeline_mode=pl.Buffered(1))
        except Exception:  # older JAX without pipeline_mode / Buffered(1)
            pass
    return pl.BlockSpec(block_shape, index_map)


def _fold_bn(gamma, beta, mean, var):
    scale = gamma / jnp.sqrt(var + EPS)
    shift = beta - mean * scale
    return scale, shift


def _pick_cout_tile(cout, tn_max=512):
    """Cout tile: multiple of 128 when Cout is large, else the full width."""
    if cout <= tn_max or cout % 128 != 0:
        return cout
    tn = tn_max - (tn_max % 128)
    while tn >= 128:
        if cout % tn == 0:
            return tn
        tn -= 128
    return 128


def _pick_th(ho, wo, rows_target=256):
    """Row tile (in output rows) for conv2: divisor of Ho, rows%8==0 preferred."""
    divs = [d for d in range(1, ho + 1) if ho % d == 0]
    ok = [d for d in divs if (d * wo) % 8 == 0]
    cand = ok if ok else divs  # TODO(synk): pad rows if no 8-aligned tile exists
    target = max(1, rows_target // max(1, wo))
    small = [d for d in cand if d <= target]
    return max(small) if small else min(cand)


def _mosaic_params(semantics, working_set_bytes):
    kwargs = {"dimension_semantics": semantics}
    # Raise the scoped VMEM limit only when the per-step working set needs it
    # (keeps headroom on v7x's 64 MiB parts; no-op at small shapes).
    if working_set_bytes > 12 * 1024 * 1024:
        kwargs["vmem_limit_bytes"] = int(min(2.2 * working_set_bytes,
                                             56 * 1024 * 1024))
    return pltpu.CompilerParams(**kwargs)


# ----------------------------------------------------------------------------
# Fused 1x1-conv kernel:
#   out = [relu]( x @ (w*scale) + shift  [+ xs @ (wsc*scale_sc)]  [+ residual] )
# bf16 MXU operands, f32 accumulation / epilogue.  Optionally emits preact.
# ----------------------------------------------------------------------------
def _make_fused_kernel(has_res, has_sc, do_relu, want_preact):
    def kernel(*refs):
        idx = 0
        x_ref = refs[idx]; idx += 1
        w_ref = refs[idx]; idx += 1
        b_ref = refs[idx]; idx += 1
        r_ref = xs_ref = wsc_ref = None
        if has_res:
            r_ref = refs[idx]; idx += 1
        if has_sc:
            xs_ref = refs[idx]; idx += 1
            wsc_ref = refs[idx]; idx += 1
        out_refs = refs[idx:]

        x = x_ref[...].astype(jnp.bfloat16)
        y = jnp.dot(x, w_ref[...], preferred_element_type=jnp.float32)
        if has_sc:  # shortcut conv fused in-kernel (no f32 residual round trip)
            xs = xs_ref[...].astype(jnp.bfloat16)
            y = y + jnp.dot(xs, wsc_ref[...], preferred_element_type=jnp.float32)
        y = y + b_ref[...]
        if has_res:  # identity shortcut, passed as bf16
            y = y + r_ref[...].astype(jnp.float32)

        if want_preact:
            preact_ref, out_ref = out_refs
            preact_ref[...] = y.astype(preact_ref.dtype)
        else:
            (out_ref,) = out_refs
        if do_relu:
            y = jnp.maximum(y, 0.0)
        out_ref[...] = y.astype(out_ref.dtype)

    return kernel


def fused_matmul_bn(x2d, w, scale, shift, *, relu, residual=None, shortcut=None,
                    want_preact=False, out_dtype=jnp.bfloat16,
                    tm_max=512, tn_max=512):
    """x2d: (M, K), w: (K, Cout), scale/shift: (Cout,).

    residual: (M, Cout) identity shortcut (added as-is, bf16 in-kernel).
    shortcut: (xs (M, Ksc), wsc (Ksc, Cout), scale_sc, shift_sc) -> shortcut
              1x1 conv + BN computed inside the same kernel.
    """
    M, K = x2d.shape
    Kw, Cout = w.shape
    assert K == Kw
    assert residual is None or shortcut is None

    # Row tiling: pad M up to a multiple of the tile (no silent single block).
    tm = min(tm_max, _round_up(M, 8))
    m_pad = _round_up(M, tm)
    pad_rows = m_pad - M
    tn = _pick_cout_tile(Cout, tn_max)
    n_ct = Cout // tn
    single_w = (n_ct == 1)

    def _pad_r(a):
        return a if pad_rows == 0 else jnp.pad(a, ((0, pad_rows), (0, 0)))

    # Fold BN scale into weight columns; only the shift stays in the epilogue.
    w_eff = (w * scale[None, :]).astype(jnp.bfloat16)
    bias = shift

    in_specs = [
        pl.BlockSpec((tm, K), lambda i, j: (i, 0)),
        _spec((K, tn), lambda i, j: (0, j), single_buffer=single_w),
        _spec((1, tn), lambda i, j: (0, j), single_buffer=single_w),
    ]
    extra_args, extra_specs, extra_bytes, extra_flops = [], [], 0, 0
    if shortcut is not None:
        xs, wsc, ssc, bsc = shortcut
        ksc = xs.shape[1]
        wsc_eff = (wsc * ssc[None, :]).astype(jnp.bfloat16)
        bias = bias + bsc
        extra_args = [_pad_r(xs.astype(jnp.bfloat16)), wsc_eff]
        extra_specs = [pl.BlockSpec((tm, ksc), lambda i, j: (i, 0)),
                       _spec((ksc, tn), lambda i, j: (0, j),
                             single_buffer=single_w)]
        extra_bytes = tm * ksc * 2 + ksc * tn * 2
        extra_flops = 2 * m_pad * ksc * Cout
    elif residual is not None:
        extra_args = [_pad_r(residual.astype(jnp.bfloat16))]
        extra_specs = [pl.BlockSpec((tm, tn), lambda i, j: (i, j))]
        extra_bytes = tm * tn * 2

    bias2d = bias.reshape(1, Cout).astype(jnp.float32)
    args = [_pad_r(x2d), w_eff, bias2d] + extra_args
    in_specs = in_specs + extra_specs

    out_spec = pl.BlockSpec((tm, tn), lambda i, j: (i, j))
    out_bytes = tm * tn * jnp.dtype(out_dtype).itemsize
    if want_preact:
        out_shape = (jax.ShapeDtypeStruct((m_pad, Cout), jnp.float32),
                     jax.ShapeDtypeStruct((m_pad, Cout), out_dtype))
        out_specs = [out_spec, out_spec]
        out_bytes += tm * tn * 4
    else:
        out_shape = jax.ShapeDtypeStruct((m_pad, Cout), out_dtype)
        out_specs = out_spec

    block_bytes = tm * K * 2 + K * tn * 2 + tn * 4 + extra_bytes + out_bytes
    cost = pl.CostEstimate(
        flops=2 * m_pad * K * Cout + extra_flops, transcendentals=0,
        bytes_accessed=int(sum(a.size * a.dtype.itemsize for a in args)
                           + (m_pad * Cout) * (4 + 2 if want_preact
                                               else jnp.dtype(out_dtype).itemsize)))

    kernel = _make_fused_kernel(residual is not None, shortcut is not None,
                                relu, want_preact)
    result = pl.pallas_call(
        kernel,
        out_shape=out_shape,
        grid_spec=pltpu.PrefetchScalarGridSpec(
            num_scalar_prefetch=0,
            grid=(m_pad // tm, n_ct),
            in_specs=in_specs,
            out_specs=out_specs,
        ),
        compiler_params=_mosaic_params(("parallel", "parallel"),
                                       2 * block_bytes),
        cost_estimate=cost,
    )(*args)

    if want_preact:
        preact, out = result
        if pad_rows:
            preact, out = preact[:M], out[:M]
        return preact, out
    return result if pad_rows == 0 else result[:M]


# ----------------------------------------------------------------------------
# 3x3 conv (stride, pad=1) + folded BN + ReLU.
# Phase-decomposed input, row-tiled grid; the 9 taps are concatenated along K
# into a VMEM scratch patch and consumed by ONE fat MXU matmul (K = 9*C).
# ----------------------------------------------------------------------------
def _make_conv2_kernel(s, th, wo, c, taps):
    def kernel(x_ref, w_ref, b_ref, o_ref, patch_ref):
        xb = x_ref[0]                              # (s*s, th+E, PW, C) bf16
        for t, (dh, dw) in enumerate(taps):
            p = (dh % s) * s + (dw % s)            # which phase
            oh, ow = dh // s, dw // s              # unit-stride offset in phase
            patch_ref[:, t * c:(t + 1) * c] = (
                xb[p, oh:oh + th, ow:ow + wo, :].reshape(th * wo, c))
        y = jnp.dot(patch_ref[...], w_ref[...],
                    preferred_element_type=jnp.float32) + b_ref[...]
        o_ref[...] = jnp.maximum(y, 0.0).astype(o_ref.dtype)

    return kernel


def conv3x3_bn_relu(x_nhwc, w_taps, scale, shift, *, stride,
                    out_dtype=jnp.bfloat16, rows_target=256):
    """x_nhwc: (N, H, W, C) (C lane-padded); w_taps: (9, C, Cout), t = kh*3+kw.

    Returns flattened NHWC rows: (N*Ho*Wo, Cout).
    """
    N, H, W, C = x_nhwc.shape
    Cout = w_taps.shape[-1]
    s = stride
    Ho = (H - 1) // s + 1
    Wo = (W - 1) // s + 1
    E = 2 // s                          # halo rows/cols each phase carries
    PH, PW = Ho + E, Wo + E

    # BN scale folded into weights, taps concatenated along the contraction dim.
    w_eff = (w_taps * scale[None, None, :]).astype(jnp.bfloat16).reshape(9 * C, Cout)
    bias = shift.reshape(1, Cout).astype(jnp.float32)

    xpad = jnp.pad(x_nhwc.astype(jnp.bfloat16),
                   ((0, 0), (1, 1), (1, 1), (0, 0)))
    # Phase decomposition (~1x reshuffle, absorbs the stride so every in-kernel
    # tap access is a unit-stride static slice).  Padded rows/cols added only
    # to equalize phase shapes; they are never addressed by any tap.
    phases = []
    for a in range(s):
        for b in range(s):
            ph = xpad[:, a::s, b::s, :][:, :PH, :PW, :]
            pad_h, pad_w = PH - ph.shape[1], PW - ph.shape[2]
            if pad_h or pad_w:
                ph = jnp.pad(ph, ((0, 0), (0, pad_h), (0, pad_w), (0, 0)))
            phases.append(ph)
    xph = jnp.stack(phases, axis=1)                    # (N, s*s, PH, PW, C)

    th = _pick_th(Ho, Wo, rows_target)
    nrt = Ho // th
    if nrt == 1:
        xt = xph                                       # (N, s*s, PH, PW, C)
    else:                                              # halo'd row windows
        xt = jnp.stack([xph[:, :, r * th:r * th + th + E] for r in range(nrt)],
                       axis=1)
        xt = xt.reshape(N * nrt, s * s, th + E, PW, C)

    M = N * Ho * Wo
    rows = th * Wo
    taps = [(dh, dw) for dh in range(3) for dw in range(3)]
    kernel = _make_conv2_kernel(s, th, Wo, C, taps)

    block_bytes = (s * s * (th + E) * PW * C * 2 + 9 * C * Cout * 2 + Cout * 4
                   + rows * Cout * jnp.dtype(out_dtype).itemsize)
    scratch_bytes = rows * 9 * C * 2
    cost = pl.CostEstimate(
        flops=2 * M * 9 * C * Cout, transcendentals=0,
        bytes_accessed=int(xt.size * 2 + w_eff.size * 2 + bias.size * 4 +
                           M * Cout * jnp.dtype(out_dtype).itemsize))

    return pl.pallas_call(
        kernel,
        out_shape=jax.ShapeDtypeStruct((M, Cout), out_dtype),
        grid_spec=pltpu.PrefetchScalarGridSpec(
            num_scalar_prefetch=0,
            grid=(N * nrt,),
            in_specs=[
                pl.BlockSpec((1, s * s, th + E, PW, C),
                             lambda g: (g, 0, 0, 0, 0)),
                _spec((9 * C, Cout), lambda g: (0, 0), single_buffer=True),
                _spec((1, Cout), lambda g: (0, 0), single_buffer=True),
            ],
            out_specs=pl.BlockSpec((rows, Cout), lambda g: (g, 0)),
            scratch_shapes=[pltpu.VMEM((rows, 9 * C), jnp.bfloat16)],
        ),
        compiler_params=_mosaic_params(("parallel",),
                                       2 * block_bytes + scratch_bytes),
        cost_estimate=cost,
    )(xt, w_eff, bias)


# ----------------------------------------------------------------------------
# Bottleneck forward (glue in plain JAX, compute in Pallas kernels)
# ----------------------------------------------------------------------------
def bottleneck_forward(x_nchw, p, *, stride, is_last):
    x = jnp.transpose(x_nchw, (0, 2, 3, 1)).astype(jnp.bfloat16)   # NHWC bf16
    N, H, W, Cin = x.shape
    planes = p["w1"].shape[1]
    exp_planes = p["w3"].shape[1]

    # Lane-pad internal (planes) channel dims to a multiple of 128 so conv1/2
    # stores are unmasked and MXU tiles are full; padded channels stay 0.
    planes_p = _round_up(planes, 128)
    pc = planes_p - planes

    s1, b1 = _fold_bn(p["bn1_g"], p["bn1_b"], p["bn1_m"], p["bn1_v"])
    s2, b2 = _fold_bn(p["bn2_g"], p["bn2_b"], p["bn2_m"], p["bn2_v"])
    s3, b3 = _fold_bn(p["bn3_g"], p["bn3_b"], p["bn3_m"], p["bn3_v"])

    w1 = jnp.pad(p["w1"], ((0, 0), (0, pc)))
    s1p, b1p = jnp.pad(s1, (0, pc)), jnp.pad(b1, (0, pc))
    w2 = jnp.pad(p["w2"], ((0, 0), (0, pc), (0, pc)))
    s2p, b2p = jnp.pad(s2, (0, pc)), jnp.pad(b2, (0, pc))
    w3 = jnp.pad(p["w3"], ((0, pc), (0, 0)))

    # ---- conv1 (1x1) + bn1 + relu -> bf16 (M1, planes_p) ---------------------
    out1 = fused_matmul_bn(x.reshape(N * H * W, Cin), w1, s1p, b1p,
                           relu=True, out_dtype=jnp.bfloat16)
    out1 = out1.reshape(N, H, W, planes_p)

    # ---- conv2 (3x3, stride, pad=1) + bn2 + relu -> bf16 (M2, planes_p) ------
    out2 = conv3x3_bn_relu(out1, w2, s2p, b2p, stride=stride,
                           out_dtype=jnp.bfloat16)
    Ho = (H - 1) // stride + 1
    Wo = (W - 1) // stride + 1
    M2 = N * Ho * Wo

    # ---- conv3 (1x1) + bn3 + shortcut + relu (+preact), shortcut fused -------
    if "w_sc" in p:
        ssc, bsc = _fold_bn(p["bnsc_g"], p["bnsc_b"], p["bnsc_m"], p["bnsc_v"])
        # TODO(synk): fold the ::stride subsample into the kernel DMA.
        xs = x[:, ::stride, ::stride, :].reshape(M2, Cin)
        res = fused_matmul_bn(out2, w3, s3, b3, relu=True,
                              shortcut=(xs, p["w_sc"], ssc, bsc),
                              want_preact=is_last, out_dtype=jnp.bfloat16)
    else:
        res = fused_matmul_bn(out2, w3, s3, b3, relu=True,
                              residual=x.reshape(M2, Cin),
                              want_preact=is_last, out_dtype=jnp.bfloat16)

    if is_last:
        preact, out = res
    else:
        out = res

    out = jnp.transpose(out.reshape(N, Ho, Wo, exp_planes),
                        (0, 3, 1, 2)).astype(jnp.float32)
    if is_last:
        preact = jnp.transpose(preact.reshape(N, Ho, Wo, exp_planes),
                               (0, 3, 1, 2))
        return out, preact
    return out


# ----------------------------------------------------------------------------
# Pure-JAX reference (correctness check only)
# ----------------------------------------------------------------------------
def reference_forward(x, raw, *, stride, is_last):
    def conv(x, w, stride=1, pad=0):
        return jax.lax.conv_general_dilated(
            x, w, (stride, stride), [(pad, pad), (pad, pad)],
            dimension_numbers=("NCHW", "OIHW", "NCHW"))

    def bn(x, g, b, m, v):
        g, b, m, v = (t[None, :, None, None] for t in (g, b, m, v))
        return (x - m) / jnp.sqrt(v + EPS) * g + b

    out = jax.nn.relu(bn(conv(x, raw["c1"]), *raw["bn1"]))
    out = jax.nn.relu(bn(conv(out, raw["c2"], stride=stride, pad=1), *raw["bn2"]))
    out = bn(conv(out, raw["c3"]), *raw["bn3"])
    if "csc" in raw:
        sc = bn(conv(x, raw["csc"], stride=stride), *raw["bnsc"])
    else:
        sc = x
    out = out + sc
    preact = out
    out = jax.nn.relu(out)
    return (out, preact) if is_last else out


# ----------------------------------------------------------------------------
# Deterministic parameter construction (synthetic; mirrors __init__ shapes)
# ----------------------------------------------------------------------------
def make_params(key, in_planes, planes, stride):
    expansion = 4
    ks = jax.random.split(key, 24)
    ki = iter(range(24))

    def nrm(shape, s=0.1):
        return s * jax.random.normal(ks[next(ki)], shape, dtype=jnp.float32)

    def bn_params(c):
        g = 1.0 + nrm((c,))
        b = nrm((c,))
        m = nrm((c,))
        v = 1.0 + jnp.abs(nrm((c,)))
        return (g, b, m, v)

    raw = {
        "c1": nrm((planes, in_planes, 1, 1)),
        "bn1": bn_params(planes),
        "c2": nrm((planes, planes, 3, 3)),
        "bn2": bn_params(planes),
        "c3": nrm((expansion * planes, planes, 1, 1)),
        "bn3": bn_params(expansion * planes),
    }
    need_sc = (stride != 1) or (in_planes != expansion * planes)
    if need_sc:
        raw["csc"] = nrm((expansion * planes, in_planes, 1, 1))
        raw["bnsc"] = bn_params(expansion * planes)

    # Repack for the Pallas (matmul) layout.
    p = {
        "w1": jnp.transpose(raw["c1"][:, :, 0, 0], (1, 0)),              # (Cin, planes)
        "w2": jnp.transpose(raw["c2"], (2, 3, 1, 0)).reshape(9, planes,  # (9, planes, planes)
                                                             planes),
        "w3": jnp.transpose(raw["c3"][:, :, 0, 0], (1, 0)),              # (planes, 4*planes)
    }
    for name, bnp in (("bn1", raw["bn1"]), ("bn2", raw["bn2"]), ("bn3", raw["bn3"])):
        p[f"{name}_g"], p[f"{name}_b"], p[f"{name}_m"], p[f"{name}_v"] = bnp
    if need_sc:
        p["w_sc"] = jnp.transpose(raw["csc"][:, :, 0, 0], (1, 0))        # (Cin, 4*planes)
        p["bnsc_g"], p["bnsc_b"], p["bnsc_m"], p["bnsc_v"] = raw["bnsc"]
    return raw, p


if __name__ == "__main__":
    in_planes, planes, stride, is_last = 16, 8, 2, True
    N, H, W = 2, 16, 16

    key = jax.random.PRNGKey(0)
    kx, kp = jax.random.split(key)
    x = jax.random.normal(kx, (N, in_planes, H, W), dtype=jnp.float32)
    raw, params = make_params(kp, in_planes, planes, stride)

    fwd = jax.jit(functools.partial(bottleneck_forward, stride=stride,
                                    is_last=is_last))
    out, preact = fwd(x, params)
    jax.block_until_ready(out)
    jax.block_until_ready(preact)

    ref_out, ref_preact = reference_forward(x, raw, stride=stride, is_last=is_last)
    assert out.shape == (N, 4 * planes, H // stride, W // stride)
    # bf16 MXU operands + bf16 inter-stage activations => tolerance looser
    # than the pure-f32 path (accumulation stays f32, so error remains small).
    assert jnp.allclose(out, ref_out, rtol=2e-2, atol=2e-2), "out mismatch"
    assert jnp.allclose(preact, ref_preact, rtol=2e-2, atol=2e-2), "preact mismatch"

    print("KERNEL_OK")
</pallas_src>

<mosaic_0001>
module attributes {stable_mosaic.version = 11 : i64} {
  func.func @kernel(%arg0: i32, %arg1: i32, %arg2: memref<512x16xbf16, #tpu.memory_space<vmem>>, %arg3: memref<16x128xbf16, #tpu.memory_space<vmem>>, %arg4: memref<1x128xf32, #tpu.memory_space<vmem>>, %arg5: memref<512x128xbf16, #tpu.memory_space<vmem>>) attributes {dimension_semantics = [#tpu.dimension_semantics<parallel>, #tpu.dimension_semantics<parallel>], iteration_bounds = array<i64: 1, 1>, scalar_prefetch = 0 : i64, scratch_operands = 0 : i64, tpu.core_type = #tpu.core_type<tc>, window_params = [{transform_indices = @transform_0, window_bounds = array<i64: 512, 16>}, {pipeline_mode = #tpu.pipeline_mode<synchronous>, transform_indices = @transform_1, window_bounds = array<i64: 16, 128>}, {pipeline_mode = #tpu.pipeline_mode<synchronous>, transform_indices = @transform_2, window_bounds = array<i64: 1, 128>}, {transform_indices = @transform_3, window_bounds = array<i64: 512, 128>}]} {
    %c0 = arith.constant 0 : index
    %c0_0 = arith.constant 0 : index
    %0 = vector.load %arg2[%c0, %c0_0] : memref<512x16xbf16, #tpu.memory_space<vmem>>, vector<512x16xbf16>
    %c0_1 = arith.constant 0 : index
    %c0_2 = arith.constant 0 : index
    %1 = vector.load %arg3[%c0_1, %c0_2] : memref<16x128xbf16, #tpu.memory_space<vmem>>, vector<16x128xbf16>
    %cst = arith.constant dense<0.000000e+00> : vector<512x128xf32>
    %2 = tpu.matmul %0, %1, %cst {dimension_numbers = #tpu.dot_dimension_numbers<[1], [0], [0], [1], [0, 0, 1, 1], [], []>} : vector<512x16xbf16>, vector<16x128xbf16>, vector<512x128xf32> -> vector<512x128xf32>
    %c0_3 = arith.constant 0 : index
    %c0_4 = arith.constant 0 : index
    %3 = vector.load %arg4[%c0_3, %c0_4] : memref<1x128xf32, #tpu.memory_space<vmem>>, vector<1x128xf32>
    %4 = vector.broadcast %3 : vector<1x128xf32> to vector<512x128xf32>
    %5 = arith.addf %2, %4 : vector<512x128xf32>
    %cst_5 = arith.constant 0.000000e+00 : f32
    %6 = vector.broadcast %cst_5 : f32 to vector<512x128xf32>
    %7 = arith.maximumf %5, %6 : vector<512x128xf32>
    %8 = arith.truncf %7 : vector<512x128xf32> to vector<512x128xbf16>
    %c0_6 = arith.constant 0 : index
    %c0_7 = arith.constant 0 : index
    %9 = vector.load %arg5[%c0_6, %c0_7] : memref<512x128xbf16, #tpu.memory_space<vmem>>, vector<512x128xbf16>
    tpu.vector_store %arg5[%c0_6, %c0_7], %8 {strides = array<i32>} : memref<512x128xbf16, #tpu.memory_space<vmem>>, vector<512x128xbf16>,
    return
  }
  func.func @transform_0(%arg0: i32, %arg1: i32) -> (i32, i32) {
    %c0_i32 = arith.constant 0 : i32
    %c0_i32_0 = arith.constant 0 : i32
    return %arg0, %c0_i32 : i32, i32
  }
  func.func @transform_1(%arg0: i32, %arg1: i32) -> (i32, i32) {
    %c0_i32 = arith.constant 0 : i32
    %c0_i32_0 = arith.constant 0 : i32
    return %c0_i32, %arg1 : i32, i32
  }
  func.func @transform_2(%arg0: i32, %arg1: i32) -> (i32, i32) {
    %c0_i32 = arith.constant 0 : i32
    %c0_i32_0 = arith.constant 0 : i32
    return %c0_i32, %arg1 : i32, i32
  }
  func.func @transform_3(%arg0: i32, %arg1: i32) -> (i32, i32) {
    %c0_i32 = arith.constant 0 : i32
    return %arg0, %arg1 : i32, i32
  }
}

module attributes {stable_mosaic.version = 11 : i64} {
  func.func @kernel(%arg0: i32, %arg1: memref<1x4x9x9x128xbf16, #tpu.memory_space<vmem>>, %arg2: memref<1152x128xbf16, #tpu.memory_space<vmem>>, %arg3: memref<1x128xf32, #tpu.memory_space<vmem>>, %arg4: memref<64x128xbf16, #tpu.memory_space<vmem>>, %arg5: memref<64x1152xbf16, #tpu.memory_space<vmem>>) attributes {dimension_semantics = [#tpu.dimension_semantics<parallel>], iteration_bounds = array<i64: 2>, scalar_prefetch = 0 : i64, scratch_operands = 1 : i64, tpu.core_type = #tpu.core_type<tc>, window_params = [{transform_indices = @transform_0, window_bounds = array<i64: 1, 4, 9, 9, 128>}, {pipeline_mode = #tpu.pipeline_mode<synchronous>, transform_indices = @transform_1, window_bounds = array<i64: 1152, 128>}, {pipeline_mode = #tpu.pipeline_mode<synchronous>, transform_indices = @transform_2, window_bounds = array<i64: 1, 128>}, {transform_indices = @transform_3, window_bounds = array<i64: 64, 128>}]} {
    %c0 = arith.constant 0 : index
    %c0_0 = arith.constant 0 : index
    %c0_1 = arith.constant 0 : index
    %c0_2 = arith.constant 0 : index
    %c0_3 = arith.constant 0 : index
    %0 = vector.load %arg1[%c0, %c0_0, %c0_1, %c0_2, %c0_3] : memref<1x4x9x9x128xbf16, #tpu.memory_space<vmem>>, vector<1x4x9x9x128xbf16>
    %1 = vector.shape_cast %0 : vector<1x4x9x9x128xbf16> to vector<4x9x9x128xbf16>
    %2 = vector.extract_strided_slice %1 {offsets = [0, 0, 0, 0], sizes = [1, 8, 8, 128], strides = [1, 1, 1, 1]} : vector<4x9x9x128xbf16> to vector<1x8x8x128xbf16>
    %3 = vector.shape_cast %2 : vector<1x8x8x128xbf16> to vector<8x8x128xbf16>
    %4 = vector.shape_cast %3 : vector<8x8x128xbf16> to vector<64x128xbf16>
    %c0_4 = arith.constant 0 : index
    %c0_5 = arith.constant 0 : index
    %5 = vector.load %arg5[%c0_4, %c0_5] : memref<64x1152xbf16, #tpu.memory_space<vmem>>, vector<64x128xbf16>
    tpu.vector_store %arg5[%c0_4, %c0_5], %4 {strides = array<i32>} : memref<64x1152xbf16, #tpu.memory_space<vmem>>, vector<64x128xbf16>,
    %6 = vector.extract_strided_slice %1 {offsets = [1, 0, 0, 0], sizes = [1, 8, 8, 128], strides = [1, 1, 1, 1]} : vector<4x9x9x128xbf16> to vector<1x8x8x128xbf16>
    %7 = vector.shape_cast %6 : vector<1x8x8x128xbf16> to vector<8x8x128xbf16>
    %8 = vector.shape_cast %7 : vector<8x8x128xbf16> to vector<64x128xbf16>
    %c0_6 = arith.constant 0 : index
    %c128 = arith.constant 128 : index
    %9 = vector.load %arg5[%c0_6, %c128] : memref<64x1152xbf16, #tpu.memory_space<vmem>>, vector<64x128xbf16>
    tpu.vector_store %arg5[%c0_6, %c128], %8 {strides = array<i32>} : memref<64x1152xbf16, #tpu.memory_space<vmem>>, vector<64x128xbf16>,
    %10 = vector.extract_strided_slice %1 {offsets = [0, 0, 1, 0], sizes = [1, 8, 8, 128], strides = [1, 1, 1, 1]} : vector<4x9x9x128xbf16> to vector<1x8x8x128xbf16>
    %11 = vector.shape_cast %10 : vector<1x8x8x128xbf16> to vector<8x8x128xbf16>
    %12 = vector.shape_cast %11 : vector<8x8x128xbf16> to vector<64x128xbf16>
    %c0_7 = arith.constant 0 : index
    %c256 = arith.constant 256 : index
    %13 = vector.load %arg5[%c0_7, %c256] : memref<64x1152xbf16, #tpu.memory_space<vmem>>, vector<64x128xbf16>
    tpu.vector_store %arg5[%c0_7, %c256], %12 {strides = array<i32>} : memref<64x1152xbf16, #tpu.memory_space<vmem>>, vector<64x128xbf16>,
    %14 = vector.extract_strided_slice %1 {offsets = [2, 0, 0, 0], sizes = [1, 8, 8, 128], strides = [1, 1, 1, 1]} : vector<4x9x9x128xbf16> to vector<1x8x8x128xbf16>
    %15 = vector.shape_cast %14 : vector<1x8x8x128xbf16> to vector<8x8x128xbf16>
    %16 = vector.shape_cast %15 : vector<8x8x128xbf16> to vector<64x128xbf16>
    %c0_8 = arith.constant 0 : index
    %c384 = arith.constant 384 : index
    %17 = vector.load %arg5[%c0_8, %c384] : memref<64x1152xbf16, #tpu.memory_space<vmem>>, vector<64x128xbf16>
    tpu.vector_store %arg5[%c0_8, %c384], %16 {strides = array<i32>} : memref<64x1152xbf16, #tpu.memory_space<vmem>>, vector<64x128xbf16>,
    %18 = vector.extract_strided_slice %1 {offsets = [3, 0, 0, 0], sizes = [1, 8, 8, 128], strides = [1, 1, 1, 1]} : vector<4x9x9x128xbf16> to vector<1x8x8x128xbf16>
    %19 = vector.shape_cast %18 : vector<1x8x8x128xbf16> to vector<8x8x128xbf16>
    %20 = vector.shape_cast %19 : vector<8x8x128xbf16> to vector<64x128xbf16>
    %c0_9 = arith.constant 0 : index
    %c512 = arith.constant 512 : index
    %21 = vector.load %arg5[%c0_9, %c512] : memref<64x1152xbf16, #tpu.memory_space<vmem>>, vector<64x128xbf16>
    tpu.vector_store %arg5[%c0_9, %c512], %20 {strides = array<i32>} : memref<64x1152xbf16, #tpu.memory_space<vmem>>, vector<64x128xbf16>,
    %22 = vector.extract_strided_slice %1 {offsets = [2, 0, 1, 0], sizes = [1, 8, 8, 128], strides = [1, 1, 1, 1]} : vector<4x9x9x128xbf16> to vector<1x8x8x128xbf16>
    %23 = vector.shape_cast %22 : vector<1x8x8x128xbf16> to vector<8x8x128xbf16>
    %24 = vector.shape_cast %23 : vector<8x8x128xbf16> to vector<64x128xbf16>
    %c0_10 = arith.constant 0 : index
    %c640 = arith.constant 640 : index
    %25 = vector.load %arg5[%c0_10, %c640] : memref<64x1152xbf16, #tpu.memory_space<vmem>>, vector<64x128xbf16>
    tpu.vector_store %arg5[%c0_10, %c640], %24 {strides = array<i32>} : memref<64x1152xbf16, #tpu.memory_space<vmem>>, vector<64x128xbf16>,
    %26 = vector.extract_strided_slice %1 {offsets = [0, 1, 0, 0], sizes = [1, 8, 8, 128], strides = [1, 1, 1, 1]} : vector<4x9x9x128xbf16> to vector<1x8x8x128xbf16>
    %27 = vector.shape_cast %26 : vector<1x8x8x128xbf16> to vector<8x8x128xbf16>
    %28 = vector.shape_cast %27 : vector<8x8x128xbf16> to vector<64x128xbf16>
    %c0_11 = arith.constant 0 : index
    %c768 = arith.constant 768 : index
    %29 = vector.load %arg5[%c0_11, %c768] : memref<64x1152xbf16, #tpu.memory_space<vmem>>, vector<64x128xbf16>
    tpu.vector_store %arg5[%c0_11, %c768], %28 {strides = array<i32>} : memref<64x1152xbf16, #tpu.memory_space<vmem>>, vector<64x128xbf16>,
    %30 = vector.extract_strided_slice %1 {offsets = [1, 1, 0, 0], sizes = [1, 8, 8, 128], strides = [1, 1, 1, 1]} : vector<4x9x9x128xbf16> to vector<1x8x8x128xbf16>
    %31 = vector.shape_cast %30 : vector<1x8x8x128xbf16> to vector<8x8x128xbf16>
    %32 = vector.shape_cast %31 : vector<8x8x128xbf16> to vector<64x128xbf16>
    %c0_12 = arith.constant 0 : index
    %c896 = arith.constant 896 : index
    %33 = vector.load %arg5[%c0_12, %c896] : memref<64x1152xbf16, #tpu.memory_space<vmem>>, vector<64x128xbf16>
    tpu.vector_store %arg5[%c0_12, %c896], %32 {strides = array<i32>} : memref<64x1152xbf16, #tpu.memory_space<vmem>>, vector<64x128xbf16>,
    %34 = vector.extract_strided_slice %1 {offsets = [0, 1, 1, 0], sizes = [1, 8, 8, 128], strides = [1, 1, 1, 1]} : vector<4x9x9x128xbf16> to vector<1x8x8x128xbf16>
    %35 = vector.shape_cast %34 : vector<1x8x8x128xbf16> to vector<8x8x128xbf16>
    %36 = vector.shape_cast %35 : vector<8x8x128xbf16> to vector<64x128xbf16>
    %c0_13 = arith.constant 0 : index
    %c1024 = arith.constant 1024 : index
    %37 = vector.load %arg5[%c0_13, %c1024] : memref<64x1152xbf16, #tpu.memory_space<vmem>>, vector<64x128xbf16>
    tpu.vector_store %arg5[%c0_13, %c1024], %36 {strides = array<i32>} : memref<64x1152xbf16, #tpu.memory_space<vmem>>, vector<64x128xbf16>,
    %c0_14 = arith.constant 0 : index
    %c0_15 = arith.constant 0 : index
    %38 = vector.load %arg5[%c0_14, %c0_15] : memref<64x1152xbf16, #tpu.memory_space<vmem>>, vector<64x1152xbf16>
    %c0_16 = arith.constant 0 : index
    %c0_17 = arith.constant 0 : index
    %39 = vector.load %arg2[%c0_16, %c0_17] : memref<1152x128xbf16, #tpu.memory_space<vmem>>, vector<1152x128xbf16>
    %cst = arith.constant dense<0.000000e+00> : vector<64x128xf32>
    %40 = tpu.matmul %38, %39, %cst {dimension_numbers = #tpu.dot_dimension_numbers<[1], [0], [0], [1], [0, 0, 1, 1], [], []>} : vector<64x1152xbf16>, vector<1152x128xbf16>, vector<64x128xf32> -> vector<64x128xf32>
    %c0_18 = arith.constant 0 : index
    %c0_19 = arith.constant 0 : index
    %41 = vector.load %arg3[%c0_18, %c0_19] : memref<1x128xf32, #tpu.memory_space<vmem>>, vector<1x128xf32>
    %42 = vector.broadcast %41 : vector<1x128xf32> to vector<64x128xf32>
    %43 = arith.addf %40, %42 : vector<64x128xf32>
    %cst_20 = arith.constant 0.000000e+00 : f32
    %44 = vector.broadcast %cst_20 : f32 to vector<64x128xf32>
    %45 = arith.maximumf %43, %44 : vector<64x128xf32>
    %46 = arith.truncf %45 : vector<64x128xf32> to vector<64x128xbf16>
    %c0_21 = arith.constant 0 : index
    %c0_22 = arith.constant 0 : index
    %47 = vector.load %arg4[%c0_21, %c0_22] : memref<64x128xbf16, #tpu.memory_space<vmem>>, vector<64x128xbf16>
    tpu.vector_store %arg4[%c0_21, %c0_22], %46 {strides = array<i32>} : memref<64x128xbf16, #tpu.memory_space<vmem>>, vector<64x128xbf16>,
    return
  }
  func.func @transform_0(%arg0: i32) -> (i32, i32, i32, i32, i32) {
    %c0_i32 = arith.constant 0 : i32
    %c0_i32_0 = arith.constant 0 : i32
    %c0_i32_1 = arith.constant 0 : i32
    %c0_i32_2 = arith.constant 0 : i32
    %c0_i32_3 = arith.constant 0 : i32
    return %arg0, %c0_i32, %c0_i32_0, %c0_i32_1, %c0_i32_2 : i32, i32, i32, i32, i32
  }
  func.func @transform_1(%arg0: i32) -> (i32, i32) {
    %c0_i32 = arith.constant 0 : i32
    %c0_i32_0 = arith.constant 0 : i32
    %c0_i32_1 = arith.constant 0 : i32
    return %c0_i32, %c0_i32_0 : i32, i32
  }
  func.func @transform_2(%arg0: i32) -> (i32, i32) {
    %c0_i32 = arith.constant 0 : i32
    %c0_i32_0 = arith.constant 0 : i32
    %c0_i32_1 = arith.constant 0 : i32
    return %c0_i32, %c0_i32_0 : i32, i32
  }
  func.func @transform_3(%arg0: i32) -> (i32, i32) {
    %c0_i32 = arith.constant 0 : i32
    %c0_i32_0 = arith.constant 0 : i32
    return %arg0, %c0_i32 : i32, i32
  }
}

module attributes {stable_mosaic.version = 11 : i64} {
  func.func @kernel(%arg0: i32, %arg1: i32, %arg2: memref<128x128xbf16, #tpu.memory_space<vmem>>, %arg3: memref<128x32xbf16, #tpu.memory_space<vmem>>, %arg4: memref<1x32xf32, #tpu.memory_space<vmem>>, %arg5: memref<128x16xbf16, #tpu.memory_space<vmem>>, %arg6: memref<16x32xbf16, #tpu.memory_space<vmem>>, %arg7: memref<128x32xf32, #tpu.memory_space<vmem>>, %arg8: memref<128x32xbf16, #tpu.memory_space<vmem>>) attributes {dimension_semantics = [#tpu.dimension_semantics<parallel>, #tpu.dimension_semantics<parallel>], iteration_bounds = array<i64: 1, 1>, scalar_prefetch = 0 : i64, scratch_operands = 0 : i64, tpu.core_type = #tpu.core_type<tc>, window_params = [{transform_indices = @transform_0, window_bounds = array<i64: 128, 128>}, {pipeline_mode = #tpu.pipeline_mode<synchronous>, transform_indices = @transform_1, window_bounds = array<i64: 128, 32>}, {pipeline_mode = #tpu.pipeline_mode<synchronous>, transform_indices = @transform_2, window_bounds = array<i64: 1, 32>}, {transform_indices = @transform_3, window_bounds = array<i64: 128, 16>}, {pipeline_mode = #tpu.pipeline_mode<synchronous>, transform_indices = @transform_4, window_bounds = array<i64: 16, 32>}, {transform_indices = @transform_5, window_bounds = array<i64: 128, 32>}, {transform_indices = @transform_6, window_bounds = array<i64: 128, 32>}]} {
    %c0 = arith.constant 0 : index
    %c0_0 = arith.constant 0 : index
    %0 = vector.load %arg2[%c0, %c0_0] : memref<128x128xbf16, #tpu.memory_space<vmem>>, vector<128x128xbf16>
    %c0_1 = arith.constant 0 : index
    %c0_2 = arith.constant 0 : index
    %1 = vector.load %arg3[%c0_1, %c0_2] : memref<128x32xbf16, #tpu.memory_space<vmem>>, vector<128x32xbf16>
    %cst = arith.constant dense<0.000000e+00> : vector<128x32xf32>
    %2 = tpu.matmul %0, %1, %cst {dimension_numbers = #tpu.dot_dimension_numbers<[1], [0], [0], [1], [0, 0, 1, 1], [], []>} : vector<128x128xbf16>, vector<128x32xbf16>, vector<128x32xf32> -> vector<128x32xf32>
    %c0_3 = arith.constant 0 : index
    %c0_4 = arith.constant 0 : index
    %3 = vector.load %arg5[%c0_3, %c0_4] : memref<128x16xbf16, #tpu.memory_space<vmem>>, vector<128x16xbf16>
    %c0_5 = arith.constant 0 : index
    %c0_6 = arith.constant 0 : index
    %4 = vector.load %arg6[%c0_5, %c0_6] : memref<16x32xbf16, #tpu.memory_space<vmem>>, vector<16x32xbf16>
    %cst_7 = arith.constant dense<0.000000e+00> : vector<128x32xf32>
    %5 = tpu.matmul %3, %4, %cst_7 {dimension_numbers = #tpu.dot_dimension_numbers<[1], [0], [0], [1], [0, 0, 1, 1], [], []>} : vector<128x16xbf16>, vector<16x32xbf16>, vector<128x32xf32> -> vector<128x32xf32>
    %6 = arith.addf %2, %5 : vector<128x32xf32>
    %c0_8 = arith.constant 0 : index
    %c0_9 = arith.constant 0 : index
    %7 = vector.load %arg4[%c0_8, %c0_9] : memref<1x32xf32, #tpu.memory_space<vmem>>, vector<1x32xf32>
    %8 = vector.broadcast %7 : vector<1x32xf32> to vector<128x32xf32>
    %9 = arith.addf %6, %8 : vector<128x32xf32>
    %c0_10 = arith.constant 0 : index
    %c0_11 = arith.constant 0 : index
    %10 = vector.load %arg7[%c0_10, %c0_11] : memref<128x32xf32, #tpu.memory_space<vmem>>, vector<128x32xf32>
    tpu.vector_store %arg7[%c0_10, %c0_11], %9 {strides = array<i32>} : memref<128x32xf32, #tpu.memory_space<vmem>>, vector<128x32xf32>,
    %cst_12 = arith.constant 0.000000e+00 : f32
    %11 = vector.broadcast %cst_12 : f32 to vector<128x32xf32>
    %12 = arith.maximumf %9, %11 : vector<128x32xf32>
    %13 = arith.truncf %12 : vector<128x32xf32> to vector<128x32xbf16>
    %c0_13 = arith.constant 0 : index
    %c0_14 = arith.constant 0 : index
    %14 = vector.load %arg8[%c0_13, %c0_14] : memref<128x32xbf16, #tpu.memory_space<vmem>>, vector<128x32xbf16>
    tpu.vector_store %arg8[%c0_13, %c0_14], %13 {strides = array<i32>} : memref<128x32xbf16, #tpu.memory_space<vmem>>, vector<128x32xbf16>,
    return
  }
  func.func @transform_0(%arg0: i32, %arg1: i32) -> (i32, i32) {
    %c0_i32 = arith.constant 0 : i32
    %c0_i32_0 = arith.constant 0 : i32
    return %arg0, %c0_i32 : i32, i32
  }
  func.func @transform_1(%arg0: i32, %arg1: i32) -> (i32, i32) {
    %c0_i32 = arith.constant 0 : i32
    %c0_i32_0 = arith.constant 0 : i32
    return %c0_i32, %arg1 : i32, i32
  }
  func.func @transform_2(%arg0: i32, %arg1: i32) -> (i32, i32) {
    %c0_i32 = arith.constant 0 : i32
    %c0_i32_0 = arith.constant 0 : i32
    return %c0_i32, %arg1 : i32, i32
  }
  func.func @transform_3(%arg0: i32, %arg1: i32) -> (i32, i32) {
    %c0_i32 = arith.constant 0 : i32
    %c0_i32_0 = arith.constant 0 : i32
    return %arg0, %c0_i32 : i32, i32
  }
  func.func @transform_4(%arg0: i32, %arg1: i32) -> (i32, i32) {
    %c0_i32 = arith.constant 0 : i32
    %c0_i32_0 = arith.constant 0 : i32
    return %c0_i32, %arg1 : i32, i32
  }
  func.func @transform_5(%arg0: i32, %arg1: i32) -> (i32, i32) {
    %c0_i32 = arith.constant 0 : i32
    return %arg0, %arg1 : i32, i32
  }
  func.func @transform_6(%arg0: i32, %arg1: i32) -> (i32, i32) {
    %c0_i32 = arith.constant 0 : i32
    return %arg0, %arg1 : i32, i32
  }
}

</mosaic_0001>

<bundles_post_ra>
// kernel: bottleneck_forward.3
= control target key start
LH: loop header
LB: loop body
LE: loop exit
PB: predicated region body
PF: predicated region fallthrough
CT: control target
= control target key end

     0   :  { %vm254_vm0 = vcmask 130048   ;;  %s1863_s1 = inlined_call_operand.vmem [shape: bf16[16,128], index: 1, kind: input, shape index: {}]   ;;  %s1864_s0 = inlined_call_operand.vmem [shape: bf16[512,16], index: 0, kind: input, shape index: {}]   ;;  %s1865_s2 = inlined_call_operand.vmem [shape: f32[1,128], index: 2, kind: input, shape index: {}]   ;;  %s1866_s3 = inlined_call_operand.vmem [shape: bf16[512,128], index: 3, kind: output, shape index: {}]  }
   0x1   :  { %v1514_v0 = vld [vmem:[%s1863_s1] sm:$0xff]   ;;  %v1517_v3 = vld [vmem:[%s1864_s0 + $0x8] sm:$0xff]   ;;  %v1519_v5 = vld [vmem:[%s1864_s0 + $0x10] sm:$0xff]  }
   0x2   :  { %v1515_v1 = vld [vmem:[%s1864_s0] sm:$0xff]   ;;  %1446 = vmatprep.subr.bf16.mxu0 %v1514_v0  ;;  %1512 = vmatprep.subr.bf16.mxu1 %v1514_v0  ;;  %v1518_v4 = vld [vmem:[%s1864_s0 + $0x88] sm:$0xff]   ;;  %v1520_v6 = vld [vmem:[%s1864_s0 + $0x90] sm:$0xff]  }
   0x3   :  { %v1516_v2 = vld [vmem:[%s1864_s0 + $0x80] sm:$0xff]   ;;  %1447 = vmatpush3.bf16.msra.mxu0 %v1514_v0  ;;  %1513 = vmatpush3.bf16.msra.mxu1 %v1514_v0  ;;  %v1521_v7 = vld [vmem:[%s1864_s0 + $0x18] sm:$0xff]   ;;  %v1525_v11 = vld [vmem:[%s1864_s0 + $0x28] sm:$0xff]  }
   0x4   :  { %1448 = vmatprep.mubr.msk.bf16.mxu0 %vm254_vm0, %v1515_v1  ;;  %1480 = vmatprep.mubr.msk.bf16.mxu1 %vm254_vm0, %v1516_v2  ;;  %v1522_v8 = vld [vmem:[%s1864_s0 + $0x98] sm:$0xff]   ;;  %v1523_v9 = vld [vmem:[%s1864_s0 + $0x20] sm:$0xff]   ;;  %v1526_v12 = vld [vmem:[%s1864_s0 + $0xa8] sm:$0xff]  }
   0x5   :  { %v1524_v10 = vld [vmem:[%s1864_s0 + $0xa0] sm:$0xff]   ;;  %v1527_v13 = vld [vmem:[%s1864_s0 + $0x30] sm:$0xff]   ;;  %v1529_v15 = vld [vmem:[%s1864_s0 + $0x38] sm:$0xff]  }
   0x6   :  { %1449 = vmatmul.mubr.msk.bf16.vlgmr.msra.gmra.mxu0 %vm254_vm0, %v1517_v3  ;;  %1481 = vmatmul.mubr.msk.bf16.vlgmr.msra.gmra.mxu1 %vm254_vm0, %v1518_v4  ;;  %v1528_v14 = vld [vmem:[%s1864_s0 + $0xb0] sm:$0xff]   ;;  %v1530_v16 = vld [vmem:[%s1864_s0 + $0xb8] sm:$0xff]   ;;  %v1531_v17 = vld [vmem:[%s1864_s0 + $0x40] sm:$0xff]  }
   0x7   :  { %1452 = vmatprep.mubr.msk.bf16.mxu0 %vm254_vm0, %v1519_v5  ;;  %1484 = vmatprep.mubr.msk.bf16.mxu1 %vm254_vm0, %v1520_v6  ;;  %v1532_v18 = vld [vmem:[%s1864_s0 + $0xc0] sm:$0xff]   ;;  %v1533_v19 = vld [vmem:[%s1864_s0 + $0x48] sm:$0xff]   ;;  %v1535_v21 = vld [vmem:[%s1864_s0 + $0x50] sm:$0xff]  }
   0x8   :  { %v1534_v20 = vld [vmem:[%s1864_s0 + $0xc8] sm:$0xff]   ;;  %v1536_v22 = vld [vmem:[%s1864_s0 + $0xd0] sm:$0xff]   ;;  %v1537_v23 = vld [vmem:[%s1864_s0 + $0x58] sm:$0xff]  }
   0x9   :  { %v1538_v24 = vld [vmem:[%s1864_s0 + $0xd8] sm:$0xff]   ;;  %v1539_v25 = vld [vmem:[%s1864_s0 + $0x60] sm:$0xff]   ;;  %v1541_v27 = vld [vmem:[%s1864_s0 + $0x68] sm:$0xff]  }
   0xa   :  { %v1540_v26 = vld [vmem:[%s1864_s0 + $0xe0] sm:$0xff]   ;;  %v1542_v28 = vld [vmem:[%s1864_s0 + $0xe8] sm:$0xff]   ;;  %v1543_v29 = vld [vmem:[%s1864_s0 + $0x70] sm:$0xff]  }
   0xb   :  { %v1544_v30 = vld [vmem:[%s1864_s0 + $0xf0] sm:$0xff]   ;;  %v1545_v31 = vld [vmem:[%s1864_s0 + $0x78] sm:$0xff]   ;;  %v1701_v33 = vld [vmem:[%s1865_s2] ss:$0 sm:$0xff] }
   0xc   :  { %v1546_v32 = vld [vmem:[%s1864_s0 + $0xf8] sm:$0xff]  }
   0xe   :  { %1453 = vmatmul.mubr.msk.bf16.gmra.mxu0 %vm254_vm0, %v1521_v7  ;;  %1485 = vmatmul.mubr.msk.bf16.gmra.mxu1 %vm254_vm0, %v1522_v8 }
   0xf   :  { %1456 = vmatprep.mubr.msk.bf16.mxu0 %vm254_vm0, %v1523_v9  ;;  %1488 = vmatprep.mubr.msk.bf16.mxu1 %vm254_vm0, %v1524_v10 }
  0x16   :  { %1457 = vmatmul.mubr.msk.bf16.gmra.mxu0 %vm254_vm0, %v1525_v11  ;;  %1489 = vmatmul.mubr.msk.bf16.gmra.mxu1 %vm254_vm0, %v1526_v12 }
  0x17   :  { %1460 = vmatprep.mubr.msk.bf16.mxu0 %vm254_vm0, %v1527_v13  ;;  %1492 = vmatprep.mubr.msk.bf16.mxu1 %vm254_vm0, %v1528_v14 }
  0x1e   :  { %1461 = vmatmul.mubr.msk.bf16.gmra.mxu0 %vm254_vm0, %v1529_v15  ;;  %1493 = vmatmul.mubr.msk.bf16.gmra.mxu1 %vm254_vm0, %v1530_v16 }
  0x1f   :  { %1464 = vmatprep.mubr.msk.bf16.mxu0 %vm254_vm0, %v1531_v17  ;;  %1496 = vmatprep.mubr.msk.bf16.mxu1 %vm254_vm0, %v1532_v18 }
  0x26   :  { %1465 = vmatmul.mubr.msk.bf16.gmra.mxu0 %vm254_vm0, %v1533_v19  ;;  %1497 = vmatmul.mubr.msk.bf16.gmra.mxu1 %vm254_vm0, %v1534_v20 }
  0x27   :  { %1468 = vmatprep.mubr.msk.bf16.mxu0 %vm254_vm0, %v1535_v21  ;;  %1500 = vmatprep.mubr.msk.bf16.mxu1 %vm254_vm0, %v1536_v22 }
  0x2e   :  { %1469 = vmatmul.mubr.msk.bf16.gmra.mxu0 %vm254_vm0, %v1537_v23  ;;  %1501 = vmatmul.mubr.msk.bf16.gmra.mxu1 %vm254_vm0, %v1538_v24 }
  0x2f   :  { %1472 = vmatprep.mubr.msk.bf16.mxu0 %vm254_vm0, %v1539_v25  ;;  %1504 = vmatprep.mubr.msk.bf16.mxu1 %vm254_vm0, %v1540_v26 }
  0x36   :  { %1473 = vmatmul.mubr.msk.bf16.gmra.mxu0 %vm254_vm0, %v1541_v27  ;;  %1505 = vmatmul.mubr.msk.bf16.gmra.mxu1 %vm254_vm0, %v1542_v28 }
  0x37   :  { %1476 = vmatprep.mubr.msk.bf16.mxu0 %vm254_vm0, %v1543_v29  ;;  %1508 = vmatprep.mubr.msk.bf16.mxu1 %vm254_vm0, %v1544_v30 }
  0x3e   :  { %1477 = vmatmul.mubr.msk.bf16.gmra.mxu0 %vm254_vm0, %v1545_v31  ;;  %1509 = vmatmul.mubr.msk.bf16.gmra.mxu1 %vm254_vm0, %v1546_v32 }
  0xc6   :  { %v1450_v34 = vpop.f32.mrf.mxu0  ;;  %v1482_v35 = vpop.f32.mrf.mxu1 }
  0xc7   :  { %v394_v36 = vadd.f32 %v1450_v34, %v1701_v33  ;;  %v522_v37 = vadd.f32 %v1482_v35, %v1701_v33 }
  0xc8   :  { %v385_v38 = vpop.f32.mrf.mxu0  ;;  %v513_v39 = vpop.f32.mrf.mxu1 }
  0xc9   :  { %v386_v40 = vadd.f32 %v1701_v33, %v385_v38  ;;  %v514_v41 = vadd.f32 %v1701_v33, %v513_v39  ;;  %v642_v46 = vmax.f32 %v394_v36, 0.0  ;;  %v674_v47 = vmax.f32 %v522_v37, 0.0 }
  0xca   :  { %v1451_v42 = vpop.f32.mrf.mxu0  ;;  %v1483_v43 = vpop.f32.mrf.mxu1 }
  0xcb   :  { %v397_v44 = vadd.f32 %v1451_v42, %v1701_v33  ;;  %v525_v45 = vadd.f32 %v1483_v43, %v1701_v33  ;;  %v640_v54 = vmax.f32 %v386_v40, 0.0  ;;  %v672_v55 = vmax.f32 %v514_v41, 0.0 }
  0xcc   :  { %v388_v48 = vpop.f32.mrf.mxu0  ;;  %v516_v49 = vpop.f32.mrf.mxu1 }
  0xcd   :  { %v643_v50 = vmax.f32 %v397_v44, 0.0  ;;  %v675_v51 = vmax.f32 %v525_v45, 0.0  ;;  %v389_v52 = vadd.f32 %v1701_v33, %v388_v48  ;;  %v517_v53 = vadd.f32 %v1701_v33, %v516_v49 }
  0xce   :  { %v1454_v56 = vpop.f32.mrf.mxu0  ;;  %v1486_v57 = vpop.f32.mrf.mxu1 }
  0xcf   :  { %v1230_v58 = vpack.c.bf16 %v643_v50, %v642_v46  ;;  %v1310_v59 = vpack.c.bf16 %v675_v51, %v674_v47  ;;  %v641_v60 = vmax.f32 %v389_v52, 0.0  ;;  %v673_v61 = vmax.f32 %v517_v53, 0.0 }
  0xd0   :  { %v410_v62 = vadd.f32 %v1454_v56, %v1701_v33  ;;  %v538_v63 = vadd.f32 %v1486_v57, %v1701_v33  ;;  %v401_v0 = vpop.f32.mrf.mxu0  ;;  %v529_v1 = vpop.f32.mrf.mxu1 }
  0xd1   :  { %1382 = vst [vmem:[%s1866_s3 + $0x8] sm:$0xff] %v1230_v58   ;;  %1398 = vst [vmem:[%s1866_s3 + $0x88] sm:$0xff] %v1310_v59   ;;  %v1225_v2 = vpack.c.bf16 %v641_v60, %v640_v54  ;;  %v1305_v3 = vpack.c.bf16 %v673_v61, %v672_v55  ;;  %v402_v4 = vadd.f32 %v1701_v33, %v401_v0 }
  0xd2   :  { %v530_v5 = vadd.f32 %v1701_v33, %v529_v1  ;;  %v1455_v6 = vpop.f32.mrf.mxu0  ;;  %v1487_v7 = vpop.f32.mrf.mxu1  ;;  %v646_v10 = vmax.f32 %v410_v62, 0.0  ;;  %v678_v11 = vmax.f32 %v538_v63, 0.0 }
  0xd3   :  { %1226 = vst [vmem:[%s1866_s3] sm:$0xff] %v1225_v2   ;;  %1397 = vst [vmem:[%s1866_s3 + $0x80] sm:$0xff] %v1305_v3   ;;  %v413_v8 = vadd.f32 %v1455_v6, %v1701_v33  ;;  %v541_v9 = vadd.f32 %v1487_v7, %v1701_v33  ;;  %v644_v18 = vmax.f32 %v402_v4, 0.0 }
  0xd4   :  { %v404_v12 = vpop.f32.mrf.mxu0  ;;  %v532_v13 = vpop.f32.mrf.mxu1  ;;  %v676_v19 = vmax.f32 %v530_v5, 0.0 }
  0xd5   :  { %v647_v14 = vmax.f32 %v413_v8, 0.0  ;;  %v679_v15 = vmax.f32 %v541_v9, 0.0  ;;  %v405_v16 = vadd.f32 %v1701_v33, %v404_v12  ;;  %v533_v17 = vadd.f32 %v1701_v33, %v532_v13 }
  0xd6   :  { %v1458_v20 = vpop.f32.mrf.mxu0  ;;  %v1490_v21 = vpop.f32.mrf.mxu1 }
  0xd7   :  { %v1240_v22 = vpack.c.bf16 %v647_v14, %v646_v10  ;;  %v1320_v23 = vpack.c.bf16 %v679_v15, %v678_v11  ;;  %v645_v24 = vmax.f32 %v405_v16, 0.0  ;;  %v677_v25 = vmax.f32 %v533_v17, 0.0 }
  0xd8   :  { %v426_v26 = vadd.f32 %v1458_v20, %v1701_v33  ;;  %v554_v27 = vadd.f32 %v1490_v21, %v1701_v33  ;;  %v417_v28 = vpop.f32.mrf.mxu0  ;;  %v545_v29 = vpop.f32.mrf.mxu1 }
  0xd9   :  { %1384 = vst [vmem:[%s1866_s3 + $0x18] sm:$0xff] %v1240_v22   ;;  %1400 = vst [vmem:[%s1866_s3 + $0x98] sm:$0xff] %v1320_v23   ;;  %v1235_v30 = vpack.c.bf16 %v645_v24, %v644_v18  ;;  %v1315_v31 = vpack.c.bf16 %v677_v25, %v676_v19  ;;  %v418_v32 = vadd.f32 %v1701_v33, %v417_v28 }
  0xda   :  { %v546_v34 = vadd.f32 %v1701_v33, %v545_v29  ;;  %v1459_v35 = vpop.f32.mrf.mxu0  ;;  %v1491_v36 = vpop.f32.mrf.mxu1  ;;  %v650_v39 = vmax.f32 %v426_v26, 0.0  ;;  %v682_v40 = vmax.f32 %v554_v27, 0.0 }
  0xdb   :  { %1383 = vst [vmem:[%s1866_s3 + $0x10] sm:$0xff] %v1235_v30   ;;  %1399 = vst [vmem:[%s1866_s3 + $0x90] sm:$0xff] %v1315_v31   ;;  %v429_v37 = vadd.f32 %v1459_v35, %v1701_v33  ;;  %v557_v38 = vadd.f32 %v1491_v36, %v1701_v33  ;;  %v648_v47 = vmax.f32 %v418_v32, 0.0 }
  0xdc   :  { %v420_v41 = vpop.f32.mrf.mxu0  ;;  %v548_v42 = vpop.f32.mrf.mxu1  ;;  %v680_v48 = vmax.f32 %v546_v34, 0.0 }
  0xdd   :  { %v651_v43 = vmax.f32 %v429_v37, 0.0  ;;  %v683_v44 = vmax.f32 %v557_v38, 0.0  ;;  %v421_v45 = vadd.f32 %v1701_v33, %v420_v41  ;;  %v549_v46 = vadd.f32 %v1701_v33, %v548_v42 }
  0xde   :  { %v1462_v49 = vpop.f32.mrf.mxu0  ;;  %v1494_v50 = vpop.f32.mrf.mxu1 }
  0xdf   :  { %v1250_v51 = vpack.c.bf16 %v651_v43, %v650_v39  ;;  %v1330_v52 = vpack.c.bf16 %v683_v44, %v682_v40  ;;  %v649_v53 = vmax.f32 %v421_v45, 0.0  ;;  %v681_v54 = vmax.f32 %v549_v46, 0.0 }
  0xe0   :  { %v442_v55 = vadd.f32 %v1462_v49, %v1701_v33  ;;  %v570_v56 = vadd.f32 %v1494_v50, %v1701_v33  ;;  %v433_v57 = vpop.f32.mrf.mxu0  ;;  %v561_v58 = vpop.f32.mrf.mxu1 }
  0xe1   :  { %1386 = vst [vmem:[%s1866_s3 + $0x28] sm:$0xff] %v1250_v51   ;;  %1402 = vst [vmem:[%s1866_s3 + $0xa8] sm:$0xff] %v1330_v52   ;;  %v1245_v59 = vpack.c.bf16 %v649_v53, %v648_v47  ;;  %v1325_v60 = vpack.c.bf16 %v681_v54, %v680_v48  ;;  %v434_v61 = vadd.f32 %v1701_v33, %v433_v57 }
  0xe2   :  { %v562_v62 = vadd.f32 %v1701_v33, %v561_v58  ;;  %v1463_v63 = vpop.f32.mrf.mxu0  ;;  %v1495_v0 = vpop.f32.mrf.mxu1  ;;  %v654_v3 = vmax.f32 %v442_v55, 0.0  ;;  %v686_v4 = vmax.f32 %v570_v56, 0.0 }
  0xe3   :  { %1385 = vst [vmem:[%s1866_s3 + $0x20] sm:$0xff] %v1245_v59   ;;  %1401 = vst [vmem:[%s1866_s3 + $0xa0] sm:$0xff] %v1325_v60   ;;  %v445_v1 = vadd.f32 %v1463_v63, %v1701_v33  ;;  %v573_v2 = vadd.f32 %v1495_v0, %v1701_v33  ;;  %v652_v11 = vmax.f32 %v434_v61, 0.0 }
  0xe4   :  { %v436_v5 = vpop.f32.mrf.mxu0  ;;  %v564_v6 = vpop.f32.mrf.mxu1  ;;  %v684_v12 = vmax.f32 %v562_v62, 0.0 }
  0xe5   :  { %v655_v7 = vmax.f32 %v445_v1, 0.0  ;;  %v687_v8 = vmax.f32 %v573_v2, 0.0  ;;  %v437_v9 = vadd.f32 %v1701_v33, %v436_v5  ;;  %v565_v10 = vadd.f32 %v1701_v33, %v564_v6 }
  0xe6   :  { %v1466_v13 = vpop.f32.mrf.mxu0  ;;  %v1498_v14 = vpop.f32.mrf.mxu1 }
  0xe7   :  { %v1260_v15 = vpack.c.bf16 %v655_v7, %v654_v3  ;;  %v1340_v16 = vpack.c.bf16 %v687_v8, %v686_v4  ;;  %v653_v17 = vmax.f32 %v437_v9, 0.0  ;;  %v685_v18 = vmax.f32 %v565_v10, 0.0 }
  0xe8   :  { %v458_v19 = vadd.f32 %v1466_v13, %v1701_v33  ;;  %v586_v20 = vadd.f32 %v1498_v14, %v1701_v33  ;;  %v449_v21 = vpop.f32.mrf.mxu0  ;;  %v577_v22 = vpop.f32.mrf.mxu1 }
  0xe9   :  { %1388 = vst [vmem:[%s1866_s3 + $0x38] sm:$0xff] %v1260_v15   ;;  %1404 = vst [vmem:[%s1866_s3 + $0xb8] sm:$0xff] %v1340_v16   ;;  %v1255_v23 = vpack.c.bf16 %v653_v17, %v652_v11  ;;  %v1335_v24 = vpack.c.bf16 %v685_v18, %v684_v12  ;;  %v450_v25 = vadd.f32 %v1701_v33, %v449_v21 }
  0xea   :  { %v578_v26 = vadd.f32 %v1701_v33, %v577_v22  ;;  %v1467_v27 = vpop.f32.mrf.mxu0  ;;  %v1499_v28 = vpop.f32.mrf.mxu1  ;;  %v658_v31 = vmax.f32 %v458_v19, 0.0  ;;  %v690_v32 = vmax.f32 %v586_v20, 0.0 }
  0xeb   :  { %1387 = vst [vmem:[%s1866_s3 + $0x30] sm:$0xff] %v1255_v23   ;;  %1403 = vst [vmem:[%s1866_s3 + $0xb0] sm:$0xff] %v1335_v24   ;;  %v461_v29 = vadd.f32 %v1467_v27, %v1701_v33  ;;  %v589_v30 = vadd.f32 %v1499_v28, %v1701_v33  ;;  %v656_v40 = vmax.f32 %v450_v25, 0.0 }
  0xec   :  { %v452_v34 = vpop.f32.mrf.mxu0  ;;  %v580_v35 = vpop.f32.mrf.mxu1  ;;  %v688_v41 = vmax.f32 %v578_v26, 0.0 }
  0xed   :  { %v659_v36 = vmax.f32 %v461_v29, 0.0  ;;  %v691_v37 = vmax.f32 %v589_v30, 0.0  ;;  %v453_v38 = vadd.f32 %v1701_v33, %v452_v34  ;;  %v581_v39 = vadd.f32 %v1701_v33, %v580_v35 }
  0xee   :  { %v1470_v42 = vpop.f32.mrf.mxu0  ;;  %v1502_v43 = vpop.f32.mrf.mxu1 }
  0xef   :  { %v1270_v44 = vpack.c.bf16 %v659_v36, %v658_v31  ;;  %v1350_v45 = vpack.c.bf16 %v691_v37, %v690_v32  ;;  %v657_v46 = vmax.f32 %v453_v38, 0.0  ;;  %v689_v47 = vmax.f32 %v581_v39, 0.0 }
  0xf0   :  { %v474_v48 = vadd.f32 %v1470_v42, %v1701_v33  ;;  %v602_v49 = vadd.f32 %v1502_v43, %v1701_v33  ;;  %v465_v50 = vpop.f32.mrf.mxu0  ;;  %v593_v51 = vpop.f32.mrf.mxu1 }
  0xf1   :  { %1390 = vst [vmem:[%s1866_s3 + $0x48] sm:$0xff] %v1270_v44   ;;  %1406 = vst [vmem:[%s1866_s3 + $0xc8] sm:$0xff] %v1350_v45   ;;  %v1265_v52 = vpack.c.bf16 %v657_v46, %v656_v40  ;;  %v1345_v53 = vpack.c.bf16 %v689_v47, %v688_v41  ;;  %v466_v54 = vadd.f32 %v1701_v33, %v465_v50 }
  0xf2   :  { %v594_v55 = vadd.f32 %v1701_v33, %v593_v51  ;;  %v1471_v56 = vpop.f32.mrf.mxu0  ;;  %v1503_v57 = vpop.f32.mrf.mxu1  ;;  %v662_v60 = vmax.f32 %v474_v48, 0.0  ;;  %v694_v61 = vmax.f32 %v602_v49, 0.0 }
  0xf3   :  { %1389 = vst [vmem:[%s1866_s3 + $0x40] sm:$0xff] %v1265_v52   ;;  %1405 = vst [vmem:[%s1866_s3 + $0xc0] sm:$0xff] %v1345_v53   ;;  %v477_v58 = vadd.f32 %v1471_v56, %v1701_v33  ;;  %v605_v59 = vadd.f32 %v1503_v57, %v1701_v33  ;;  %v660_v4 = vmax.f32 %v466_v54, 0.0 }
  0xf4   :  { %v468_v62 = vpop.f32.mrf.mxu0  ;;  %v596_v63 = vpop.f32.mrf.mxu1  ;;  %v692_v5 = vmax.f32 %v594_v55, 0.0 }
  0xf5   :  { %v663_v0 = vmax.f32 %v477_v58, 0.0  ;;  %v695_v1 = vmax.f32 %v605_v59, 0.0  ;;  %v469_v2 = vadd.f32 %v1701_v33, %v468_v62  ;;  %v597_v3 = vadd.f32 %v1701_v33, %v596_v63 }
  0xf6   :  { %v1474_v6 = vpop.f32.mrf.mxu0  ;;  %v1506_v7 = vpop.f32.mrf.mxu1 }
  0xf7   :  { %v1280_v8 = vpack.c.bf16 %v663_v0, %v662_v60  ;;  %v1360_v9 = vpack.c.bf16 %v695_v1, %v694_v61  ;;  %v661_v10 = vmax.f32 %v469_v2, 0.0  ;;  %v693_v11 = vmax.f32 %v597_v3, 0.0 }
  0xf8   :  { %v490_v12 = vadd.f32 %v1474_v6, %v1701_v33  ;;  %v618_v13 = vadd.f32 %v1506_v7, %v1701_v33  ;;  %v481_v14 = vpop.f32.mrf.mxu0  ;;  %v609_v15 = vpop.f32.mrf.mxu1 }
  0xf9   :  { %1392 = vst [vmem:[%s1866_s3 + $0x58] sm:$0xff] %v1280_v8   ;;  %1408 = vst [vmem:[%s1866_s3 + $0xd8] sm:$0xff] %v1360_v9   ;;  %v1275_v16 = vpack.c.bf16 %v661_v10, %v660_v4  ;;  %v1355_v17 = vpack.c.bf16 %v693_v11, %v692_v5  ;;  %v482_v18 = vadd.f32 %v1701_v33, %v481_v14 }
  0xfa   :  { %v610_v19 = vadd.f32 %v1701_v33, %v609_v15  ;;  %v1475_v20 = vpop.f32.mrf.mxu0  ;;  %v1507_v21 = vpop.f32.mrf.mxu1  ;;  %v666_v24 = vmax.f32 %v490_v12, 0.0  ;;  %v698_v25 = vmax.f32 %v618_v13, 0.0 }
  0xfb   :  { %1391 = vst [vmem:[%s1866_s3 + $0x50] sm:$0xff] %v1275_v16   ;;  %1407 = vst [vmem:[%s1866_s3 + $0xd0] sm:$0xff] %v1355_v17   ;;  %v493_v22 = vadd.f32 %v1475_v20, %v1701_v33  ;;  %v621_v23 = vadd.f32 %v1507_v21, %v1701_v33  ;;  %v664_v32 = vmax.f32 %v482_v18, 0.0 }
  0xfc   :  { %v484_v26 = vpop.f32.mrf.mxu0  ;;  %v612_v27 = vpop.f32.mrf.mxu1  ;;  %v696_v34 = vmax.f32 %v610_v19, 0.0 }
  0xfd   :  { %v667_v28 = vmax.f32 %v493_v22, 0.0  ;;  %v699_v29 = vmax.f32 %v621_v23, 0.0  ;;  %v485_v30 = vadd.f32 %v1701_v33, %v484_v26  ;;  %v613_v31 = vadd.f32 %v1701_v33, %v612_v27 }
  0xfe   :  { %v1478_v35 = vpop.f32.mrf.mxu0  ;;  %v1510_v36 = vpop.f32.mrf.mxu1 }
  0xff   :  { %v1290_v37 = vpack.c.bf16 %v667_v28, %v666_v24  ;;  %v1370_v38 = vpack.c.bf16 %v699_v29, %v698_v25  ;;  %v665_v39 = vmax.f32 %v485_v30, 0.0  ;;  %v697_v40 = vmax.f32 %v613_v31, 0.0 }
 0x100   :  { %v506_v41 = vadd.f32 %v1478_v35, %v1701_v33  ;;  %v634_v42 = vadd.f32 %v1510_v36, %v1701_v33  ;;  %v497_v43 = vpop.f32.mrf.mxu0  ;;  %v625_v44 = vpop.f32.mrf.mxu1 }
 0x101   :  { %1394 = vst [vmem:[%s1866_s3 + $0x68] sm:$0xff] %v1290_v37   ;;  %1410 = vst [vmem:[%s1866_s3 + $0xe8] sm:$0xff] %v1370_v38   ;;  %v1285_v45 = vpack.c.bf16 %v665_v39, %v664_v32  ;;  %v1365_v46 = vpack.c.bf16 %v697_v40, %v696_v34  ;;  %v498_v47 = vadd.f32 %v1701_v33, %v497_v43 }
 0x102   :  { %v626_v48 = vadd.f32 %v1701_v33, %v625_v44  ;;  %v1479_v49 = vpop.f32.mrf.mxu0  ;;  %v1511_v50 = vpop.f32.mrf.mxu1  ;;  %v670_v53 = vmax.f32 %v506_v41, 0.0  ;;  %v702_v54 = vmax.f32 %v634_v42, 0.0 }
 0x103   :  { %1393 = vst [vmem:[%s1866_s3 + $0x60] sm:$0xff] %v1285_v45   ;;  %1409 = vst [vmem:[%s1866_s3 + $0xe0] sm:$0xff] %v1365_v46   ;;  %v509_v51 = vadd.f32 %v1479_v49, %v1701_v33  ;;  %v637_v52 = vadd.f32 %v1511_v50, %v1701_v33  ;;  %v668_v61 = vmax.f32 %v498_v47, 0.0 }
 0x104   :  { %v500_v55 = vpop.f32.mrf.mxu0  ;;  %v628_v56 = vpop.f32.mrf.mxu1  ;;  %v700_v62 = vmax.f32 %v626_v48, 0.0 }
 0x105   :  { %v671_v57 = vmax.f32 %v509_v51, 0.0  ;;  %v703_v58 = vmax.f32 %v637_v52, 0.0  ;;  %v501_v59 = vadd.f32 %v1701_v33, %v500_v55  ;;  %v629_v60 = vadd.f32 %v1701_v33, %v628_v56 }
 0x107   :  { %v1300_v63 = vpack.c.bf16 %v671_v57, %v670_v53  ;;  %v1380_v0 = vpack.c.bf16 %v703_v58, %v702_v54  ;;  %v669_v1 = vmax.f32 %v501_v59, 0.0  ;;  %v701_v2 = vmax.f32 %v629_v60, 0.0 }
 0x109   :  { %1396 = vst [vmem:[%s1866_s3 + $0x78] sm:$0xff] %v1300_v63   ;;  %1412 = vst [vmem:[%s1866_s3 + $0xf8] sm:$0xff] %v1380_v0   ;;  %v1295_v3 = vpack.c.bf16 %v669_v1, %v668_v61  ;;  %v1375_v4 = vpack.c.bf16 %v701_v2, %v700_v62 }
 0x10b   :  { %1395 = vst [vmem:[%s1866_s3 + $0x70] sm:$0xff] %v1295_v3   ;;  %1411 = vst [vmem:[%s1866_s3 + $0xf0] sm:$0xff] %v1375_v4  }

// kernel: bottleneck_forward.5
= control target key start
LH: loop header
LB: loop body
LE: loop exit
PB: predicated region body
PF: predicated region fallthrough
CT: control target
= control target key end

     0   :  { %vm120_vm0 = vcmask 130048   ;;  %s1042_s0 = inlined_call_operand.vmem [shape: bf16[128,128], index: 0, kind: input, shape index: {}]   ;;  %s1043_s1 = inlined_call_operand.vmem [shape: bf16[128,32], index: 1, kind: input, shape index: {}]   ;;  %s1044_s2 = inlined_call_operand.vmem [shape: f32[1,32], index: 2, kind: input, shape index: {}]   ;;  %s1045_s3 = inlined_call_operand.vmem [shape: bf16[128,16], index: 3, kind: input, shape index: {}]   ;;  %s1046_s4 = inlined_call_operand.vmem [shape: bf16[16,32], index: 4, kind: input, shape index: {}]   ;;  %s1047_s5 = inlined_call_operand.hbm [shape: f32[128,32], index: 5, kind: output, shape index: {0}]   ;;  %s1048_s6 = inlined_call_operand.vmem [shape: bf16[128,32], index: 6, kind: output, shape index: {1}]  }
   0x1   :  { %v752_v0 = vld [vmem:[%s1046_s4] sm:$0xff]   ;;  %v753_v1 = vld [vmem:[%s1043_s1 + $0x38] sm:$0xff]   ;;  %v755_v3 = vld [vmem:[%s1045_s3 + $0x8] sm:$0xff]  }
   0x2   :  { %683 = vmatprep.subr.bf16.mxu0 %v752_v0  ;;  %v754_v2 = vld [vmem:[%s1045_s3] sm:$0xff]   ;;  %733 = vmatprep.subr.bf16.mxu1 %v753_v1  ;;  %v756_v4 = vld [vmem:[%s1043_s1 + $0x30] sm:$0xff]   ;;  %v757_v5 = vld [vmem:[%s1043_s1 + $0x28] sm:$0xff]  }
   0x3   :  { %684 = vmatpush3.bf16.msra.mxu0 %v752_v0  ;;  %741 = vmatpush3.bf16.msra.mxu1 %v753_v1  ;;  %v758_v6 = vld [vmem:[%s1045_s3 + $0x10] sm:$0xff]   ;;  %v760_v7 = vld [vmem:[%s1043_s1 + $0x20] sm:$0xff]   ;;  %v759_v8 = vld [vmem:[%s1045_s3 + $0x18] sm:$0xff]  }
   0x4   :  { %685 = vmatprep.mubr.msk.bf16.mxu0 %vm120_vm0, %v754_v2  ;;  %701 = vmatprep.subr.bf16.mxu0 %v753_v1  ;;  %v762_v9 = vld [vmem:[%s1045_s3 + $0x20] sm:$0xff]   ;;  %v761_v10 = vld [vmem:[%s1043_s1 + $0x18] sm:$0xff]   ;;  %v764_v11 = vld [vmem:[%s1043_s1 + $0x10] sm:$0xff]  }
   0x5   :  { %734 = vmatprep.subr.bf16.mxu1 %v756_v4  ;;  %v769_v12 = vld [vmem:[%s1042_s0 + $0x10] sm:$0xff]   ;;  %v763_v13 = vld [vmem:[%s1045_s3 + $0x28] sm:$0xff]   ;;  %v768_v16 = vld [vmem:[%s1043_s1] sm:$0xff]  }
   0x6   :  { %686 = vmatmul.mubr.msk.bf16.vlgmr.msra.gmra.mxu0 %vm120_vm0, %v755_v3  ;;  %v766_v14 = vld [vmem:[%s1045_s3 + $0x30] sm:$0xff]   ;;  %721 = vmatprep.mubr.bf16.mxu1 %v769_v12  ;;  %v765_v15 = vld [vmem:[%s1043_s1 + $0x8] sm:$0xff]  }
   0x7   :  { %702 = vmatpush3.bf16.msra.mxu0 %v753_v1  ;;  %742 = vmatpush3.bf16.msra.mxu1 %v756_v4 }
   0x8   :  { %703 = vmatprep.subr.bf16.mxu0 %v756_v4  ;;  %735 = vmatprep.subr.bf16.mxu1 %v757_v5 }
   0x9   :  { %689 = vmatprep.mubr.msk.bf16.mxu0 %vm120_vm0, %v758_v6 }
   0xb   :  { %704 = vmatpush3.bf16.msra.mxu0 %v756_v4  ;;  %743 = vmatpush3.bf16.msra.mxu1 %v757_v5 }
   0xc   :  { %705 = vmatprep.subr.bf16.mxu0 %v757_v5  ;;  %736 = vmatprep.subr.bf16.mxu1 %v760_v7 }
   0xe   :  { %690 = vmatmul.mubr.msk.bf16.gmra.mxu0 %vm120_vm0, %v759_v8 }
   0xf   :  { %706 = vmatpush3.bf16.msra.mxu0 %v757_v5  ;;  %693 = vmatprep.mubr.msk.bf16.mxu0 %vm120_vm0, %v762_v9 }
  0x10   :  { %744 = vmatpush3.bf16.msra.mxu1 %v760_v7  ;;  %707 = vmatprep.subr.bf16.mxu0 %v760_v7 }
  0x11   :  { %737 = vmatprep.subr.bf16.mxu1 %v761_v10 }
  0x13   :  { %708 = vmatpush3.bf16.msra.mxu0 %v760_v7 }
  0x14   :  { %745 = vmatpush3.bf16.msra.mxu1 %v761_v10  ;;  %709 = vmatprep.subr.bf16.mxu0 %v761_v10 }
  0x15   :  { %738 = vmatprep.subr.bf16.mxu1 %v764_v11 }
  0x16   :  { %694 = vmatmul.mubr.msk.bf16.gmra.mxu0 %vm120_vm0, %v763_v13 }
  0x17   :  { %710 = vmatpush3.bf16.msra.mxu0 %v761_v10  ;;  %697 = vmatprep.mubr.msk.bf16.mxu0 %vm120_vm0, %v766_v14 }
  0x18   :  { %746 = vmatpush3.bf16.msra.mxu1 %v764_v11  ;;  %711 = vmatprep.subr.bf16.mxu0 %v764_v11 }
  0x19   :  { %739 = vmatprep.subr.bf16.mxu1 %v765_v15 }
  0x1a   :  { %12 = vsyncpa [#allocation3], 0  ;;  %v767_v17 = vld [vmem:[%s1045_s3 + $0x38] sm:$0xff]   ;;  %v771_v18 = vld [vmem:[%s1042_s0] sm:$0xff]   ;;  %vm458_vm1 = vcmask 261120   ;;  %vm555_vm2 = vcmask 257024  }
  0x1b   :  { %712 = vmatpush3.bf16.msra.mxu0 %v764_v11  ;;  %v770_v19 = vld [vmem:[%s1042_s0 + $0x18] sm:$0xff]   ;;  %v773_v20 = vld [vmem:[%s1042_s0 + $0x20] sm:$0xff]   ;;  %v772_v21 = vld [vmem:[%s1042_s0 + $0x8] sm:$0xff]   ;;  %s799_s14 = smov [#allocation2]  }
  0x1c   :  { %747 = vmatpush3.bf16.msra.mxu1 %v765_v15  ;;  %713 = vmatprep.subr.bf16.mxu0 %v765_v15  ;;  %v774_v22 = vld [vmem:[%s1042_s0 + $0x28] sm:$0xff]   ;;  %v775_v23 = vld [vmem:[%s1042_s0 + $0x30] sm:$0xff]   ;;  %v776_v24 = vld [vmem:[%s1042_s0 + $0x38] sm:$0xff]   ;;  %s577_s15 = sshll.u32 %s799_s14, 4  ;;  %s578_s15 = int_to_ptr.vmem [resolvable:$true] %s577_s15 }
  0x1d   :  { %740 = vmatprep.subr.bf16.mxu1 %v768_v16  ;;  %v933_v41 = vld [vmem:[%s1044_s2] ss:$0 sm:$0xff]  ;;  %s777_s20 = scalar_lea.vmem %s578_s15, 2048  ;;  %p782_p1 = scmp.lt.s32.totalorder %s578_s15, %s578_s15 }
  0x1e   :  { %698 = vmatmul.mubr.msk.bf16.gmra.mxu0 %vm120_vm0, %v767_v17  ;;  %p778_p0 = scmp.ne.s32.totalorder %s578_s15, %s777_s20  ;;  %p783_p2 = scmp.lt.s32.totalorder %s777_s20, %s777_s20 }
  0x1f   :  { %714 = vmatpush3.bf16.msra.mxu0 %v765_v15  ;;  %717 = vmatprep.mubr.bf16.mxu0 %v771_v18 }
  0x20   :  { %748 = vmatpush3.bf16.msra.mxu1 %v768_v16  ;;  %715 = vmatprep.subr.bf16.mxu0 %v768_v16  ;;  %p784_p3 = por %p783_p2, %p782_p1 }
  0x22   :  { %p785_p4 = pnand %p784_p3, %p778_p0 }
  0x23   :  { %722 = vmatmul.mubr.bf16.vlgmr.msra.gmra.mxu1 %v770_v19  ;;  %716 = vmatpush3.bf16.msra.mxu0 %v768_v16 }
  0x24   :  { %725 = vmatprep.mubr.bf16.mxu1 %v773_v20 }
  0x26   :  { %718 = vmatmul.mubr.bf16.vlgmr.msra.gmra.mxu0 %v772_v21 }
  0x2b   :  { %726 = vmatmul.mubr.bf16.gmra.mxu1 %v774_v22 }
  0x2c   :  { %729 = vmatprep.mubr.bf16.mxu1 %v775_v23 }
  0x33   :  { %730 = vmatmul.mubr.bf16.gmra.mxu1 %v776_v24 }
  0xc6   :  { %v687_v25 = vpop.f32.mrf.mxu0 }
  0xc8   :  { %v179_v26 = vpop.f32.mrf.mxu0 }
  0xca   :  { %v688_v27 = vpop.f32.mrf.mxu0 }
  0xcc   :  { %v182_v28 = vpop.f32.mrf.mxu0 }
  0xce   :  { %v691_v29 = vpop.f32.mrf.mxu0 }
  0xd0   :  { %v195_v30 = vpop.f32.mrf.mxu0 }
  0xd2   :  { %v692_v31 = vpop.f32.mrf.mxu0 }
  0xd4   :  { %v198_v32 = vpop.f32.mrf.mxu0 }
  0xd6   :  { %v695_v33 = vpop.f32.mrf.mxu0 }
  0xd8   :  { %v211_v34 = vpop.f32.mrf.mxu0 }
  0xda   :  { %v920_v35 = vpop.f32.mrf.mxu0 }
  0xdc   :  { %v922_v36 = vpop.f32.mrf.mxu0 }
  0xde   :  { %v924_v37 = vpop.f32.mrf.mxu0 }
  0xe0   :  { %v926_v38 = vpop.f32.mrf.mxu0 }
  0xe2   :  { %v928_v39 = vpop.f32.mrf.mxu0 }
  0xe3   :  { %v723_v40 = vpop.f32.mrf.mxu1 }
  0xe4   :  { %v397_v42 = vadd.f32 %v723_v40, %v691_v29  ;;  %v935_v43 = vpop.f32.mrf.mxu0 }
  0xe5   :  { %v388_v44 = vpop.f32.mrf.mxu1 }
  0xe6   :  { %v448_v45 = vadd.f32 %v933_v41, %v397_v42  ;;  %v389_v46 = vadd.f32 %v388_v44, %v195_v30  ;;  %v719_v47 = vpop.f32.mrf.mxu0 }
  0xe7   :  { %v381_v48 = vadd.f32 %v719_v47, %v687_v25  ;;  %v724_v49 = vpop.f32.mrf.mxu1 }
  0xe8   :  { %465 = vst.msk [vmem:[#allocation2 + $0x30] sm:$0xff] %vm458_vm1, %v448_v45  ;;  %v481_v50 = vmax.f32 %v448_v45, 0.0  ;;  %v446_v51 = vadd.f32 %v933_v41, %v389_v46  ;;  %v400_v52 = vadd.f32 %v724_v49, %v692_v31  ;;  %v372_v53 = vpop.f32.mrf.mxu0 }
  0xe9   :  { %v444_v54 = vadd.f32 %v933_v41, %v381_v48  ;;  %v373_v55 = vadd.f32 %v372_v53, %v179_v26  ;;  %v391_v56 = vpop.f32.mrf.mxu1 }
  0xea   :  { %v648_v57 = vpack.c.bf16 %v481_v50, %v481_v50  ;;  %463 = vst.msk [vmem:[#allocation2 + $0x20] sm:$0xff] %vm458_vm1, %v446_v51  ;;  %v479_v58 = vmax.f32 %v446_v51, 0.0  ;;  %v449_v59 = vadd.f32 %v933_v41, %v400_v52  ;;  %v392_v60 = vadd.f32 %v391_v56, %v198_v32  ;;  %v720_v61 = vpop.f32.mrf.mxu0 }
  0xeb   :  { %461 = vst.msk [vmem:[#allocation2 + $0x10] sm:$0xff] %vm458_vm1, %v444_v54  ;;  %v477_v62 = vmax.f32 %v444_v54, 0.0  ;;  %v442_v63 = vadd.f32 %v933_v41, %v373_v55  ;;  %v384_v0 = vadd.f32 %v720_v61, %v688_v27  ;;  %v727_v1 = vpop.f32.mrf.mxu1 }
  0xec   :  { %562 = vst.msk [vmem:[%s1048_s6 + $0x18] sm:$0xf] %vm555_vm2, %v648_v57  ;;  %v646_v2 = vpack.c.bf16 %v479_v58, %v479_v58  ;;  %v482_v3 = vmax.f32 %v449_v59, 0.0  ;;  %v447_v4 = vadd.f32 %v933_v41, %v392_v60  ;;  %v413_v5 = vadd.f32 %v727_v1, %v695_v33  ;;  %v375_v6 = vpop.f32.mrf.mxu0 }
  0xed   :  { %466 = vst.msk [vmem:[#allocation2 + $0x38] sm:$0xff] %vm458_vm1, %v449_v59  ;;  %v644_v7 = vpack.c.bf16 %v477_v62, %v477_v62  ;;  %459 = vst.msk [vmem:[#allocation2] sm:$0xff] %vm458_vm1, %v442_v63  ;;  %v475_v8 = vmax.f32 %v442_v63, 0.0  ;;  %v445_v9 = vadd.f32 %v933_v41, %v384_v0  ;;  %v376_v10 = vadd.f32 %v375_v6, %v182_v28  ;;  %v404_v11 = vpop.f32.mrf.mxu1 }
  0xee   :  { %560 = vst.msk [vmem:[%s1048_s6 + $0x10] sm:$0xf] %vm555_vm2, %v646_v2  ;;  %v649_v12 = vpack.c.bf16 %v482_v3, %v482_v3  ;;  %v480_v13 = vmax.f32 %v447_v4, 0.0  ;;  %v452_v14 = vadd.f32 %v933_v41, %v413_v5  ;;  %v405_v15 = vadd.f32 %v404_v11, %v211_v34 }
  0xef   :  { %464 = vst.msk [vmem:[#allocation2 + $0x28] sm:$0xff] %vm458_vm1, %v447_v4  ;;  %v642_v16 = vpack.c.bf16 %v475_v8, %v475_v8  ;;  %462 = vst.msk [vmem:[#allocation2 + $0x18] sm:$0xff] %vm458_vm1, %v445_v9  ;;  %v478_v17 = vmax.f32 %v445_v9, 0.0  ;;  %v443_v18 = vadd.f32 %v933_v41, %v376_v10  ;;  %v728_v19 = vpop.f32.mrf.mxu1 }
  0xf0   :  { %558 = vst.msk [vmem:[%s1048_s6 + $0x8] sm:$0xf] %vm555_vm2, %v644_v7  ;;  %563 = vst.msk [vmem:[%s1048_s6 + $0x1c] sm:$0xf] %vm555_vm2, %v649_v12  ;;  %v647_v20 = vpack.c.bf16 %v480_v13, %v480_v13  ;;  %v485_v21 = vmax.f32 %v452_v14, 0.0  ;;  %v450_v22 = vadd.f32 %v933_v41, %v405_v15  ;;  %v416_v23 = vadd.f32 %v728_v19, %v920_v35 }
  0xf1   :  { %469 = vst.msk [vmem:[#allocation2 + $0x50] sm:$0xff] %vm458_vm1, %v452_v14  ;;  %v645_v24 = vpack.c.bf16 %v478_v17, %v478_v17  ;;  %460 = vst.msk [vmem:[#allocation2 + $0x8] sm:$0xff] %vm458_vm1, %v443_v18  ;;  %v476_v25 = vmax.f32 %v443_v18, 0.0  ;;  %v407_v26 = vpop.f32.mrf.mxu1 }
  0xf2   :  { %556 = vst.msk [vmem:[%s1048_s6] sm:$0xf] %vm555_vm2, %v642_v16  ;;  %561 = vst.msk [vmem:[%s1048_s6 + $0x14] sm:$0xf] %vm555_vm2, %v647_v20  ;;  %v652_v27 = vpack.c.bf16 %v485_v21, %v485_v21  ;;  %v483_v28 = vmax.f32 %v450_v22, 0.0  ;;  %v453_v29 = vadd.f32 %v933_v41, %v416_v23  ;;  %v408_v30 = vadd.f32 %v407_v26, %v922_v36 }
  0xf3   :  { %467 = vst.msk [vmem:[#allocation2 + $0x40] sm:$0xff] %vm458_vm1, %v450_v22  ;;  %v643_v31 = vpack.c.bf16 %v476_v25, %v476_v25  ;;  %v731_v32 = vpop.f32.mrf.mxu1 }
  0xf4   :  { %559 = vst.msk [vmem:[%s1048_s6 + $0xc] sm:$0xf] %vm555_vm2, %v645_v24  ;;  %566 = vst.msk [vmem:[%s1048_s6 + $0x28] sm:$0xf] %vm555_vm2, %v652_v27  ;;  %v650_v33 = vpack.c.bf16 %v483_v28, %v483_v28  ;;  %v486_v34 = vmax.f32 %v453_v29, 0.0  ;;  %v451_v35 = vadd.f32 %v933_v41, %v408_v30  ;;  %v429_v36 = vadd.f32 %v731_v32, %v924_v37 }
  0xf5   :  { %470 = vst.msk [vmem:[#allocation2 + $0x58] sm:$0xff] %vm458_vm1, %v453_v29  ;;  %v420_v40 = vpop.f32.mrf.mxu1 }
  0xf6   :  { %557 = vst.msk [vmem:[%s1048_s6 + $0x4] sm:$0xf] %vm555_vm2, %v643_v31  ;;  %564 = vst.msk [vmem:[%s1048_s6 + $0x20] sm:$0xf] %vm555_vm2, %v650_v33  ;;  %v653_v42 = vpack.c.bf16 %v486_v34, %v486_v34  ;;  %v484_v44 = vmax.f32 %v451_v35, 0.0  ;;  %v456_v45 = vadd.f32 %v933_v41, %v429_v36  ;;  %v421_v46 = vadd.f32 %v420_v40, %v926_v38 }
  0xf7   :  { %468 = vst.msk [vmem:[#allocation2 + $0x48] sm:$0xff] %vm458_vm1, %v451_v35  ;;  %v732_v37 = vpop.f32.mrf.mxu1 }
  0xf8   :  { %567 = vst.msk [vmem:[%s1048_s6 + $0x2c] sm:$0xf] %vm555_vm2, %v653_v42  ;;  %v651_v47 = vpack.c.bf16 %v484_v44, %v484_v44  ;;  %v489_v48 = vmax.f32 %v456_v45, 0.0  ;;  %v454_v49 = vadd.f32 %v933_v41, %v421_v46  ;;  %v432_v50 = vadd.f32 %v732_v37, %v928_v39 }
  0xf9   :  { %473 = vst.msk [vmem:[#allocation2 + $0x70] sm:$0xff] %vm458_vm1, %v456_v45  ;;  %v423_v51 = vpop.f32.mrf.mxu1 }
  0xfa   :  { %565 = vst.msk [vmem:[%s1048_s6 + $0x24] sm:$0xf] %vm555_vm2, %v651_v47  ;;  %v656_v38 = vpack.c.bf16 %v489_v48, %v489_v48  ;;  %v487_v52 = vmax.f32 %v454_v49, 0.0  ;;  %v457_v53 = vadd.f32 %v933_v41, %v432_v50  ;;  %v424_v54 = vadd.f32 %v423_v51, %v935_v43 }
  0xfb   :  { %471 = vst.msk [vmem:[#allocation2 + $0x60] sm:$0xff] %vm458_vm1, %v454_v49 }
  0xfc   :  { %570 = vst.msk [vmem:[%s1048_s6 + $0x38] sm:$0xf] %vm555_vm2, %v656_v38  ;;  %v654_v39 = vpack.c.bf16 %v487_v52, %v487_v52  ;;  %v490_v55 = vmax.f32 %v457_v53, 0.0  ;;  %v455_v56 = vadd.f32 %v933_v41, %v424_v54 }
  0xfd   :  { %474 = vst.msk [vmem:[#allocation2 + $0x78] sm:$0xff] %vm458_vm1, %v457_v53 }
  0xfe   :  { %568 = vst.msk [vmem:[%s1048_s6 + $0x30] sm:$0xf] %vm555_vm2, %v654_v39  ;;  %v657_v57 = vpack.c.bf16 %v490_v55, %v490_v55  ;;  %v488_v43 = vmax.f32 %v455_v56, 0.0 }
  0xff   :  { %472 = vst.msk [vmem:[#allocation2 + $0x68] sm:$0xff] %vm458_vm1, %v455_v56 }
 0x100   :  { %788 = shalt.err (!%p785_p4)
}
 0x101   :  { %s800_s21 = smov 128   ;;  %s801_s22 = smov 8   ;;  %571 = vst.msk [vmem:[%s1048_s6 + $0x3c] sm:$0xf] %vm555_vm2, %v657_v57  ;;  %v655_v41 = vpack.c.bf16 %v488_v43, %v488_v43 }
 0x102   :  { %583 = dma.vmem_to_hbm [thread:$0]  %s578_s15, 2048, %s1047_s5, [#allocation3], %s800_s21, %s800_s21, %s801_s22  }
 0x103   :  { %569 = vst.msk [vmem:[%s1048_s6 + $0x34] sm:$0xf] %vm555_vm2, %v655_v41 }
 0x104   :  { %797 = dma.done.wait [#allocation3], 2048  }
 0x105   :  { %798 = vsyncadd [#allocation3], 4294965248 }
 0x106   :  { %591 = vsyncpa [#allocation3], 1 }

// kernel: bottleneck_forward.4
= control target key start
LH: loop header
LB: loop body
LE: loop exit
PB: predicated region body
PF: predicated region fallthrough
CT: control target
= control target key end

     0   :  { %s2317_s12 = smov 0   ;;  %s2798_s0 = inlined_call_operand.vmem [shape: bf16[2,4,9,9,128], index: 0, kind: input, shape index: {}]   ;;  %s2799_s1 = inlined_call_operand.vmem [shape: bf16[1152,128], index: 1, kind: input, shape index: {}]   ;;  %s2800_s2 = inlined_call_operand.vmem [shape: f32[1,128], index: 2, kind: input, shape index: {}]   ;;  %s2801_s3 = inlined_call_operand.vmem [shape: bf16[128,128], index: 3, kind: output, shape index: {}]  }
   0x1 LB: > { %s2323_s13 = sadd.s32 4294967295, %s2295_s12   ;;  %p1794_p0 = scmp.ge.s32.totalorder %s2295_s12, 1  ;;  %s2295_s12 = sphi %s2317_s12, %s13_s12  }
   0x2   : > { %p137_p1 = scmp.lt.s32.totalorder %s2295_s12, 3 }
   0x4   : > { %p138_p2 = pnand %p1794_p0, %p137_p1 }
   0x6   : > { %141 = sbr.rel (%p138_p2) target bundleno = 329 (0x149), region = 32 }
   0xb   : > { %v2169_v0 = vld [vmem:[%s2799_s1 + $0x78] sm:$0xff]   ;;  %v2173_v4 = vld [vmem:[%s2799_s1 + $0x70] sm:$0xff]   ;;  %v2177_v8 = vld [vmem:[%s2799_s1 + $0x68] sm:$0xff]   ;;  %p161_p3 = scmp.lt.s32.totalorder %s2323_s13, 1  ;;  %vm240_vm0 = vsmask.f32 3328 }
   0xc   : > { %v2170_v1 = vld [vmem:[%s2799_s1 + $0xf8] sm:$0xff]   ;;  %1948 = vmatprep.subr.bf16.mxu0 %v2169_v0  ;;  %v2174_v5 = vld [vmem:[%s2799_s1 + $0xf0] sm:$0xff]   ;;  %v2178_v9 = vld [vmem:[%s2799_s1 + $0xe8] sm:$0xff]   ;;  %vm241_vm1 = vsmask.f32 7440 }
   0xd   : > { %v2171_v2 = vld [vmem:[%s2799_s1 + $0x38] sm:$0xff]   ;;  %1988 = vmatprep.subr.bf16.mxu1 %v2170_v1  ;;  %v2175_v6 = vld [vmem:[%s2799_s1 + $0x30] sm:$0xff]   ;;  %v2179_v10 = vld [vmem:[%s2799_s1 + $0x28] sm:$0xff]   ;;  %s162_s6 = scalar_select %p161_p3, %s2323_s13, 1 }
   0xe   : > { %v2172_v3 = vld [vmem:[%s2799_s1 + $0xb8] sm:$0xff]   ;;  %1949 = vmatpush3.bf16.msra.mxu0 %v2171_v2  ;;  %v2176_v7 = vld [vmem:[%s2799_s1 + $0xb0] sm:$0xff]   ;;  %v2180_v11 = vld [vmem:[%s2799_s1 + $0xa8] sm:$0xff]  }
   0xf   : > { %1989 = vmatpush3.bf16.msra.mxu1 %v2172_v3  ;;  %1950 = vmatprep.subr.bf16.mxu0 %v2173_v4  ;;  %v2181_v12 = vld [vmem:[%s2799_s1 + $0x60] sm:$0xff]   ;;  %v2185_v16 = vld [vmem:[%s2799_s1 + $0x58] sm:$0xff]   ;;  %v2189_v20 = vld [vmem:[%s2799_s1 + $0x50] sm:$0xff]   ;;  %s2160_s17 = smul.u32 288, %s162_s6 }
  0x10   : > { %1990 = vmatprep.subr.bf16.mxu1 %v2174_v5  ;;  %v2182_v13 = vld [vmem:[%s2799_s1 + $0xe0] sm:$0xff]   ;;  %v2186_v17 = vld [vmem:[%s2799_s1 + $0xd8] sm:$0xff]   ;;  %v2190_v21 = vld [vmem:[%s2799_s1 + $0xd0] sm:$0xff]  }
  0x11   : > { %v2183_v14 = vld [vmem:[%s2799_s1 + $0x20] sm:$0xff]   ;;  %v2187_v18 = vld [vmem:[%s2799_s1 + $0x18] sm:$0xff]   ;;  %v2191_v22 = vld [vmem:[%s2799_s1 + $0x10] sm:$0xff]   ;;  %s2422_s28 = scalar_lea.vmem %s2798_s0, %s2160_s17  ;;  %s1796_s17 = sshll.u32 %s2323_s13, 3 }
  0x12   : > { %1951 = vmatpush3.bf16.msra.mxu0 %v2175_v6  ;;  %v2184_v15 = vld [vmem:[%s2799_s1 + $0xa0] sm:$0xff]   ;;  %v2188_v19 = vld [vmem:[%s2799_s1 + $0x98] sm:$0xff]   ;;  %v2192_v23 = vld [vmem:[%s2799_s1 + $0x90] sm:$0xff]   ;;  %p2774_p4 = scmp.lt.s32.totalorder %s1796_s17, 15 }
  0x13   : > { %1991 = vmatpush3.bf16.msra.mxu1 %v2176_v7  ;;  %1952 = vmatprep.subr.bf16.mxu0 %v2177_v8  ;;  %v2193_v24 = vld [vmem:[%s2799_s1 + $0x48] sm:$0xff]   ;;  %v2197_v28 = vld [vmem:[%s2799_s1 + $0x40] sm:$0xff]   ;;  %v192_v35 = vld [vmem:[%s2422_s28 + $0x50] sm:$0xf] }
  0x14   : > { %1992 = vmatprep.subr.bf16.mxu1 %v2178_v9  ;;  %v2194_v25 = vld [vmem:[%s2799_s1 + $0xc8] sm:$0xff]   ;;  %v2198_v29 = vld [vmem:[%s2799_s1 + $0xc0] sm:$0xff]   ;;  %233 = vst [vmem:[#allocation2 + $0x28] sm:$0xf] %v192_v35  ;;  %523 = vst [vmem:[#allocation2 + $0x1c] sm:$0xf] %v192_v35 }
  0x15   : > { %v2195_v26 = vld [vmem:[%s2799_s1 + $0x8] sm:$0xff]   ;;  %v2199_v30 = vld [vmem:[%s2799_s1] sm:$0xff]   ;;  %v2437_v42 = vld [vmem:[%s2422_s28 + $0x90] sm:$0xf]  ;;  %s2816_s17 = smov (!%p2774_p4, %s1796_s17), 15 }
  0x16   : > { %1953 = vmatpush3.bf16.msra.mxu0 %v2179_v10  ;;  %v2196_v27 = vld [vmem:[%s2799_s1 + $0x88] sm:$0xff]   ;;  %v2200_v31 = vld [vmem:[%s2799_s1 + $0x80] sm:$0xff]   ;;  %v2440_v45 = vld [vmem:[%s2422_s28 + $0x98] sm:$0xf]  ;;  %371 = vst [vmem:[#allocation2 + $0xc] sm:$0xf] %v2437_v42 }
  0x17   : > { %1993 = vmatpush3.bf16.msra.mxu1 %v2180_v11  ;;  %1954 = vmatprep.subr.bf16.mxu0 %v2181_v12  ;;  %v173_v32 = vld [vmem:[%s2422_s28] sm:$0xf]  ;;  %v175_v33 = vld [vmem:[%s2422_s28 + $0x8] sm:$0xf]  ;;  %v174_v40 = vld [vmem:[%s2422_s28 + $0x4] sm:$0x1] }
  0x18   : > { %1994 = vmatprep.subr.bf16.mxu1 %v2182_v13  ;;  %v191_v34 = vld [vmem:[%s2422_s28 + $0x48] sm:$0xf]  ;;  %224 = vst [vmem:[#allocation2] sm:$0xf] %v173_v32  ;;  %225 = vst [vmem:[#allocation2 + $0x24] sm:$0xf] %v175_v33 }
  0x19   : > { %232 = vst [vmem:[#allocation2 + $0x4] sm:$0xf] %v191_v34  ;;  %v244_v36 = vshrl.u32 %v173_v32, 16  ;;  %v247_v37 = vshll.u32 %v173_v32, 16  ;;  %v258_v38 = vshrl.u32 %v175_v33, 16  ;;  %v261_v39 = vshll.u32 %v175_v33, 16  ;;  %vm2450_vm2 = vmor %vm240_vm0, %vm241_vm1 }
  0x1a   : > { %1955 = vmatpush3.bf16.msra.mxu0 %v2183_v14  ;;  %515 = vst [vmem:[#allocation2 + $0x18] sm:$0xf] %v175_v33  ;;  %v176_v41 = vld [vmem:[%s2422_s28 + $0xc] sm:$0x1]  ;;  %v253_v46 = vshll.u32 %v174_v40, 16  ;;  %v2207_v49 = vld [vmem:[%s2799_s1 + $0x178] sm:$0xff]  }
  0x1b   : > { %1995 = vmatpush3.bf16.msra.mxu1 %v2184_v15  ;;  %1956 = vmatprep.subr.bf16.mxu0 %v2185_v16  ;;  %v246_v43 = vrot.slane %v244_v36, 4  ;;  %v249_v44 = vrot.slane %v247_v37, 5  ;;  %v260_v47 = vrot.slane %v258_v38, 4  ;;  %v263_v48 = vrot.slane %v261_v39, 5  ;;  %372 = vst [vmem:[#allocation2 + $0x30] sm:$0xf] %v2440_v45 }
  0x1c   : > { %1996 = vmatprep.subr.bf16.mxu1 %v2186_v17  ;;  %v267_v51 = vshll.u32 %v176_v41, 16  ;;  %v2208_v52 = vld [vmem:[%s2799_s1 + $0x1f8] sm:$0xff]   ;;  %v255_v54 = vrot.slane %v253_v46, 5  ;;  %v2211_v0 = vld [vmem:[%s2799_s1 + $0x170] sm:$0xff]   ;;  %v194_v6 = vld [vmem:[%s2422_s28 + $0x60] sm:$0xf] }
  0x1d   : > { %v250_v50 = vor.u32 %v249_v44, %v246_v43  ;;  %v264_v55 = vor.u32 %v263_v48, %v260_v47  ;;  %v2209_v59 = vld [vmem:[%s2799_s1 + $0x138] sm:$0xff]   ;;  %v2213_v1 = vld [vmem:[%s2799_s1 + $0x130] sm:$0xff]   ;;  %235 = vst [vmem:[#allocation2 + $0x70] sm:$0xf] %v194_v6  ;;  %525 = vst [vmem:[#allocation2 + $0x64] sm:$0xf] %v194_v6 }
  0x1e   : > { %1957 = vmatpush3.bf16.msra.mxu0 %v2187_v18  ;;  %v269_v57 = vrot.slane %v267_v51, 5  ;;  %v177_v2 = vld [vmem:[%s2422_s28 + $0x10] sm:$0xf]  ;;  %v2210_v3 = vld [vmem:[%s2799_s1 + $0x1b8] sm:$0xff]   ;;  %v2220_v12 = vld [vmem:[%s2799_s1 + $0x168] sm:$0xff]   ;;  %v388_v36 = vshrl.u32 %v2437_v42, 16 }
  0x1f   : > { %1997 = vmatpush3.bf16.msra.mxu1 %v2188_v19  ;;  %1958 = vmatprep.subr.bf16.mxu0 %v2189_v20  ;;  %v251_v56 = vrot.slane %v250_v50, 4  ;;  %v265_v58 = vrot.slane %v264_v55, 4  ;;  %v2201_v60 = vld [vmem:[#allocation2] ss:$36 sps:$4 sm:$0xff]   ;;  %v179_v4 = vld [vmem:[%s2422_s28 + $0x18] sm:$0xf] }
  0x20   : > { %1998 = vmatprep.subr.bf16.mxu1 %v2190_v21  ;;  %v2203_v61 = vld [vmem:[#allocation2 + $0x4] ss:$36 sps:$4 sm:$0xff]   ;;  %v193_v5 = vld [vmem:[%s2422_s28 + $0x58] sm:$0xf]  ;;  %226 = vst [vmem:[#allocation2 + $0x48] sm:$0xf] %v177_v2 }
  0x21   : > { %v256_v62 = vsel %vm2450_vm2, %v251_v56, %v255_v54  ;;  %v270_v63 = vsel %vm2450_vm2, %v265_v58, %v269_v57  ;;  %1393 = vmatprep.mubr.bf16.mxu0 %v2203_v61  ;;  %516 = vst [vmem:[#allocation2 + $0x3c] sm:$0xf] %v177_v2  ;;  %v2212_v7 = vld [vmem:[%s2799_s1 + $0x1f0] sm:$0xff]   ;;  %227 = vst [vmem:[#allocation2 + $0x6c] sm:$0xf] %v179_v4  ;;  %v272_v8 = vshrl.u32 %v177_v2, 16 }
  0x22   : > { %1959 = vmatpush3.bf16.msra.mxu0 %v2191_v22  ;;  %363 = vst [vmem:[#allocation2 + $0x8] sm:$0xf] %v256_v62  ;;  %364 = vst [vmem:[#allocation2 + $0x2c] sm:$0xf] %v270_v63  ;;  %v275_v9 = vshll.u32 %v177_v2, 16  ;;  %v286_v10 = vshrl.u32 %v179_v4, 16 }
  0x23   : > { %1999 = vmatpush3.bf16.msra.mxu1 %v2192_v23  ;;  %1960 = vmatprep.subr.bf16.mxu0 %v2193_v24  ;;  %546 = vst [vmem:[#allocation2 + $0x20] sm:$0xf] %v270_v63  ;;  %234 = vst [vmem:[#allocation2 + $0x4c] sm:$0xf] %v193_v5  ;;  %v289_v11 = vshll.u32 %v179_v4, 16  ;;  %v274_v19 = vrot.slane %v272_v8, 4 }
  0x24   : > { %2000 = vmatprep.subr.bf16.mxu1 %v2194_v25  ;;  %517 = vst [vmem:[#allocation2 + $0x60] sm:$0xf] %v179_v4  ;;  %524 = vst [vmem:[#allocation2 + $0x40] sm:$0xf] %v193_v5  ;;  %v2206_v14 = vld [vmem:[#allocation2 + $0xc] ss:$36 sps:$4 sm:$0xff]  }
  0x25   : > { %v178_v15 = vld [vmem:[%s2422_s28 + $0x14] sm:$0x1]  ;;  %v180_v16 = vld [vmem:[%s2422_s28 + $0x1c] sm:$0x1]  ;;  %v2483_v17 = vld [vmem:[%s2422_s28 + $0xa0] sm:$0xf]  ;;  %1458 = vmatprep.mubr.bf16.mxu1 %v2206_v14 }
  0x26   : > { %1961 = vmatpush3.bf16.msra.mxu0 %v2195_v26  ;;  %v2486_v18 = vld [vmem:[%s2422_s28 + $0xa8] sm:$0xf]  ;;  %v277_v20 = vrot.slane %v275_v9, 5  ;;  %v281_v21 = vshll.u32 %v178_v15, 16  ;;  %v288_v22 = vrot.slane %v286_v10, 4  ;;  %v291_v23 = vrot.slane %v289_v11, 5 }
  0x27   : > { %2001 = vmatpush3.bf16.msra.mxu1 %v2196_v27  ;;  %1962 = vmatprep.subr.bf16.mxu0 %v2197_v28  ;;  %373 = vst [vmem:[#allocation2 + $0x54] sm:$0xf] %v2483_v17  ;;  %v295_v24 = vshll.u32 %v180_v16, 16  ;;  %374 = vst [vmem:[#allocation2 + $0x78] sm:$0xf] %v2486_v18  ;;  %v2214_v25 = vld [vmem:[%s2799_s1 + $0x1b0] sm:$0xff]  }
  0x28   : > { %2002 = vmatprep.subr.bf16.mxu1 %v2198_v29  ;;  %v278_v26 = vor.u32 %v277_v20, %v274_v19  ;;  %v283_v27 = vrot.slane %v281_v21, 5  ;;  %v292_v28 = vor.u32 %v291_v23, %v288_v22  ;;  %v569_v33 = vld [vmem:[#allocation2 + $0x6c] sm:$0xff]  ;;  %v391_v40 = vshll.u32 %v2437_v42, 16  ;;  %v2224_v42 = vld [vmem:[%s2799_s1 + $0x160] sm:$0xff]   ;;  %v195_v54 = vld [vmem:[%s2422_s28 + $0x68] sm:$0xf] }
  0x29   : > { %v2204_v13 = vld [vmem:[#allocation2 + $0x8] ss:$36 sps:$4 sm:$0xff]   ;;  %v297_v29 = vrot.slane %v295_v24, 5  ;;  %v402_v44 = vshrl.u32 %v2440_v45, 16  ;;  %v405_v46 = vshll.u32 %v2440_v45, 16  ;;  %v2225_v47 = vld [vmem:[%s2799_s1 + $0x1e0] sm:$0xff]  }
  0x2a   : > { %1963 = vmatpush3.bf16.msra.mxu0 %v2199_v30  ;;  %v2221_v30 = vld [vmem:[%s2799_s1 + $0x1e8] sm:$0xff]   ;;  %v279_v35 = vrot.slane %v278_v26, 4  ;;  %v293_v37 = vrot.slane %v292_v28, 4  ;;  %v416_v48 = vshrl.u32 %v2483_v17, 16  ;;  %v419_v50 = vshll.u32 %v2483_v17, 16  ;;  %v2227_v51 = vld [vmem:[%s2799_s1 + $0x1a0] sm:$0xff]  }
  0x2b   : > { %2003 = vmatpush3.bf16.msra.mxu1 %v2200_v31  ;;  %2028 = vmatprep.subr.bf16.mxu0 %v2207_v49  ;;  %v2222_v31 = vld [vmem:[%s2799_s1 + $0x128] sm:$0xff]   ;;  %v2226_v49 = vld [vmem:[%s2799_s1 + $0x120] sm:$0xff]   ;;  %v196_v55 = vld [vmem:[%s2422_s28 + $0x70] sm:$0xf]  ;;  %236 = vst [vmem:[#allocation2 + $0x94] sm:$0xf] %v195_v54 }
  0x2c   : > { %2068 = vmatprep.subr.bf16.mxu1 %v2208_v52  ;;  %v564_v32 = vld [vmem:[#allocation2 + $0x48] sm:$0xff]  ;;  %v284_v39 = vsel %vm2450_vm2, %v279_v35, %v283_v27  ;;  %v298_v41 = vsel %vm2450_vm2, %v293_v37, %v297_v29  ;;  %v181_v45 = vld [vmem:[%s2422_s28 + $0x20] sm:$0xf]  ;;  %237 = vst [vmem:[#allocation2 + $0xb8] sm:$0xf] %v196_v55  ;;  %v2538_v8 = vrot.slane %v388_v36, 4 }
  0x2d   : > { %1394 = vmatmul.mubr.bf16.vlgmr.msra.gmra.mxu0 %v2201_v60  ;;  %v2215_v34 = vld [vmem:[#allocation2 + $0x4c] ss:$36 sps:$4 sm:$0xff]   ;;  %v1808_v38 = vcombine.low %v564_v32, %v569_v33  ;;  %365 = vst [vmem:[#allocation2 + $0x50] sm:$0xf] %v284_v39  ;;  %547 = vst [vmem:[#allocation2 + $0x44] sm:$0xf] %v284_v39 }
  0x2e   : > { %2029 = vmatpush3.bf16.msra.mxu0 %v2209_v59  ;;  %1459 = vmatmul.mubr.bf16.vlgmr.msra.gmra.mxu1 %v2204_v13  ;;  %v2223_v43 = vld [vmem:[%s2799_s1 + $0x1a8] sm:$0xff]   ;;  %366 = vst [vmem:[#allocation2 + $0x74] sm:$0xf] %v298_v41  ;;  %548 = vst [vmem:[#allocation2 + $0x68] sm:$0xf] %v298_v41  ;;  %v300_v56 = vshrl.u32 %v181_v45, 16 }
  0x2f   : > { %2030 = vmatprep.subr.bf16.mxu0 %v2211_v0  ;;  %2069 = vmatpush3.bf16.msra.mxu1 %v2210_v3  ;;  %v183_v52 = vld [vmem:[%s2422_s28 + $0x28] sm:$0xf]  ;;  %228 = vst [vmem:[#allocation2 + $0x90] sm:$0xf] %v181_v45  ;;  %v303_v57 = vshll.u32 %v181_v45, 16  ;;  %v2540_v9 = vrot.slane %v391_v40, 5 }
  0x30   : > { %2070 = vmatprep.subr.bf16.mxu1 %v2212_v7  ;;  %1401 = vmatprep.mubr.bf16.mxu0 %v2215_v34  ;;  %229 = vst [vmem:[#allocation2 + $0xb4] sm:$0xf] %v183_v52  ;;  %518 = vst [vmem:[#allocation2 + $0x84] sm:$0xf] %v181_v45  ;;  %v314_v58 = vshrl.u32 %v183_v52, 16  ;;  %v317_v59 = vshll.u32 %v183_v52, 16 }
  0x31   : > { %519 = vst [vmem:[#allocation2 + $0xa8] sm:$0xf] %v183_v52  ;;  %526 = vst [vmem:[#allocation2 + $0x88] sm:$0xf] %v195_v54  ;;  %v182_v60 = vld [vmem:[%s2422_s28 + $0x24] sm:$0x1] }
  0x32   : > { %2031 = vmatpush3.bf16.msra.mxu0 %v2213_v1  ;;  %527 = vst [vmem:[#allocation2 + $0xac] sm:$0xf] %v196_v55  ;;  %v184_v61 = vld [vmem:[%s2422_s28 + $0x2c] sm:$0x1]  ;;  %v2531_v62 = vld [vmem:[%s2422_s28 + $0xb0] sm:$0xf] }
  0x33   : > { %2032 = vmatprep.subr.bf16.mxu0 %v2220_v12  ;;  %2071 = vmatpush3.bf16.msra.mxu1 %v2214_v25  ;;  %v2534_v63 = vld [vmem:[%s2422_s28 + $0xb8] sm:$0xf]  ;;  %v302_v0 = vrot.slane %v300_v56, 4  ;;  %v305_v3 = vrot.slane %v303_v57, 5  ;;  %375 = vst [vmem:[#allocation2 + $0x9c] sm:$0xf] %v2531_v62  ;;  %v394_v57 = vor.u32 %v2540_v9, %v2538_v8 }
  0x34   : > { %2072 = vmatprep.subr.bf16.mxu1 %v2221_v30  ;;  %v2217_v1 = vld [vmem:[#allocation2 + $0x54] ss:$36 sps:$4 sm:$0xff]   ;;  %376 = vst [vmem:[#allocation2 + $0xc0] sm:$0xf] %v2534_v63  ;;  %v309_v4 = vshll.u32 %v182_v60, 16  ;;  %v316_v5 = vrot.slane %v314_v58, 4 }
  0x35   : > { %1402 = vmatmul.mubr.bf16.gmra.mxu0 %v1808_v38  ;;  %v2219_v2 = vld [vmem:[#allocation2 + $0x50] ss:$36 sps:$4 sm:$0xff]   ;;  %v319_v6 = vrot.slane %v317_v59, 5  ;;  %v323_v7 = vshll.u32 %v184_v61, 16  ;;  %v430_v10 = vshrl.u32 %v2486_v18, 16  ;;  %1466 = vmatprep.mubr.bf16.mxu1 %v2217_v1  ;;  %v306_v11 = vor.u32 %v305_v3, %v302_v0  ;;  %v2233_v12 = vld [vmem:[%s2799_s1 + $0x158] sm:$0xff]  }
  0x36   : > { %2033 = vmatpush3.bf16.msra.mxu0 %v2222_v31  ;;  %v433_v13 = vshll.u32 %v2486_v18, 16  ;;  %1467 = vmatmul.mubr.bf16.gmra.mxu1 %v2219_v2  ;;  %v311_v14 = vrot.slane %v309_v4, 5  ;;  %v2234_v17 = vld [vmem:[%s2799_s1 + $0x1d8] sm:$0xff]   ;;  %v2550_v19 = vrot.slane %v402_v44, 4  ;;  %v2552_v20 = vrot.slane %v405_v46, 5  ;;  %v574_v24 = vld [vmem:[#allocation2 + $0x90] sm:$0xff] }
  0x37   : > { %2073 = vmatpush3.bf16.msra.mxu1 %v2223_v43  ;;  %2034 = vmatprep.subr.bf16.mxu0 %v2224_v42  ;;  %v320_v15 = vor.u32 %v319_v6, %v316_v5  ;;  %v325_v16 = vrot.slane %v323_v7, 5  ;;  %v2554_v21 = vrot.slane %v416_v48, 4  ;;  %v307_v22 = vrot.slane %v306_v11, 4  ;;  %v579_v18 = vld [vmem:[#allocation2 + $0xb4] sm:$0xff]  ;;  %v185_v43 = vld [vmem:[%s2422_s28 + $0x30] sm:$0xf] }
  0x38   : > { %2074 = vmatprep.subr.bf16.mxu1 %v2225_v47  ;;  %v2556_v23 = vrot.slane %v419_v50, 5  ;;  %v2228_v25 = vld [vmem:[#allocation2 + $0x94] ss:$36 sps:$4 sm:$0xff]   ;;  %v2558_v27 = vrot.slane %v430_v10, 4  ;;  %v1817_v29 = vcombine.low %v574_v24, %v579_v18  ;;  %v2565_v31 = vrot.slane %v433_v13, 5  ;;  %v2246_v7 = vld [vmem:[%s2799_s1 + $0x148] sm:$0xff]  }
  0x39   : > { %v321_v26 = vrot.slane %v320_v15, 4  ;;  %v312_v28 = vsel %vm2450_vm2, %v307_v22, %v311_v14  ;;  %v2235_v30 = vld [vmem:[%s2799_s1 + $0x118] sm:$0xff]   ;;  %1409 = vmatprep.mubr.bf16.mxu0 %v2228_v25  ;;  %v444_v34 = vshrl.u32 %v2531_v62, 16  ;;  %v2237_v35 = vld [vmem:[%s2799_s1 + $0x150] sm:$0xff]   ;;  %v447_v36 = vshll.u32 %v2531_v62, 16  ;;  %v2247_v10 = vld [vmem:[%s2799_s1 + $0x1c8] sm:$0xff]  }
  0x3a   : > { %2035 = vmatpush3.bf16.msra.mxu0 %v2226_v49  ;;  %367 = vst [vmem:[#allocation2 + $0x98] sm:$0xf] %v312_v28  ;;  %549 = vst [vmem:[#allocation2 + $0x8c] sm:$0xf] %v312_v28  ;;  %v2236_v33 = vld [vmem:[%s2799_s1 + $0x198] sm:$0xff]   ;;  %v2238_v37 = vld [vmem:[%s2799_s1 + $0x1d0] sm:$0xff]   ;;  %v408_v58 = vor.u32 %v2552_v20, %v2550_v19  ;;  %v422_v11 = vor.u32 %v2556_v23, %v2554_v21  ;;  %v436_v15 = vor.u32 %v2565_v31, %v2558_v27 }
  0x3b   : > { %2075 = vmatpush3.bf16.msra.mxu1 %v2227_v51  ;;  %2036 = vmatprep.subr.bf16.mxu0 %v2233_v12  ;;  %v326_v32 = vsel %vm2450_vm2, %v321_v26, %v325_v16  ;;  %v458_v38 = vshrl.u32 %v2534_v63, 16  ;;  %v2239_v39 = vld [vmem:[%s2799_s1 + $0x110] sm:$0xff]   ;;  %v461_v40 = vshll.u32 %v2534_v63, 16  ;;  %v187_v44 = vld [vmem:[%s2422_s28 + $0x38] sm:$0xf]  ;;  %v328_v47 = vshrl.u32 %v185_v43, 16 }
  0x3c   : > { %2076 = vmatprep.subr.bf16.mxu1 %v2234_v17  ;;  %368 = vst [vmem:[#allocation2 + $0xbc] sm:$0xf] %v326_v32  ;;  %550 = vst [vmem:[#allocation2 + $0xb0] sm:$0xf] %v326_v32  ;;  %v2240_v41 = vld [vmem:[%s2799_s1 + $0x190] sm:$0xff]   ;;  %v331_v48 = vshll.u32 %v185_v43, 16 }
  0x3d   : > { %1410 = vmatmul.mubr.bf16.gmra.mxu0 %v1817_v29  ;;  %v197_v42 = vld [vmem:[%s2422_s28 + $0x78] sm:$0xf]  ;;  %v198_v46 = vld [vmem:[%s2422_s28 + $0x80] sm:$0xf]  ;;  %230 = vst [vmem:[#allocation2 + $0xd8] sm:$0xf] %v185_v43 }
  0x3e   : > { %2037 = vmatpush3.bf16.msra.mxu0 %v2235_v30  ;;  %231 = vst [vmem:[#allocation2 + $0xfc] sm:$0xf] %v187_v44  ;;  %238 = vst [vmem:[#allocation2 + $0xdc] sm:$0xf] %v197_v42  ;;  %v342_v49 = vshrl.u32 %v187_v44, 16  ;;  %v345_v50 = vshll.u32 %v187_v44, 16 }
  0x3f   : > { %2077 = vmatpush3.bf16.msra.mxu1 %v2236_v33  ;;  %2038 = vmatprep.subr.bf16.mxu0 %v2237_v35  ;;  %520 = vst [vmem:[#allocation2 + $0xcc] sm:$0xf] %v185_v43  ;;  %521 = vst [vmem:[#allocation2 + $0xf0] sm:$0xf] %v187_v44  ;;  %v446_v51 = vrot.slane %v444_v34, 4  ;;  %v330_v56 = vrot.slane %v328_v47, 4 }
  0x40   : > { %2078 = vmatprep.subr.bf16.mxu1 %v2238_v37  ;;  %528 = vst [vmem:[#allocation2 + $0xd0] sm:$0xf] %v197_v42  ;;  %239 = vst [vmem:[#allocation2 + $0x100] sm:$0xf] %v198_v46  ;;  %v186_v45 = vld [vmem:[%s2422_s28 + $0x34] sm:$0x1] }
  0x41   : > { %529 = vst [vmem:[#allocation2 + $0xf4] sm:$0xf] %v198_v46  ;;  %v188_v52 = vld [vmem:[%s2422_s28 + $0x3c] sm:$0x1]  ;;  %v2599_v59 = vld [vmem:[%s2422_s28 + $0xc0] sm:$0xf] }
  0x42   : > { %2039 = vmatpush3.bf16.msra.mxu0 %v2239_v39  ;;  %v2230_v54 = vld [vmem:[#allocation2 + $0x9c] ss:$36 sps:$4 sm:$0xff]   ;;  %v2602_v60 = vld [vmem:[%s2422_s28 + $0xc8] sm:$0xf]  ;;  %v333_v61 = vrot.slane %v331_v48, 5  ;;  %v337_v62 = vshll.u32 %v186_v45, 16 }
  0x43   : > { %2079 = vmatpush3.bf16.msra.mxu1 %v2240_v41  ;;  %v2232_v55 = vld [vmem:[#allocation2 + $0x98] ss:$36 sps:$4 sm:$0xff]   ;;  %v449_v63 = vrot.slane %v447_v36, 5  ;;  %1474 = vmatprep.mubr.bf16.mxu1 %v2230_v54  ;;  %v344_v0 = vrot.slane %v342_v49, 4  ;;  %v347_v1 = vrot.slane %v345_v50, 5  ;;  %v351_v2 = vshll.u32 %v188_v52, 16 }
  0x44   : > { %377 = vst [vmem:[#allocation2 + $0xe4] sm:$0xf] %v2599_v59  ;;  %378 = vst [vmem:[#allocation2 + $0x108] sm:$0xf] %v2602_v60  ;;  %v460_v3 = vrot.slane %v458_v38, 4  ;;  %v463_v4 = vrot.slane %v461_v40, 5  ;;  %1475 = vmatmul.mubr.bf16.gmra.mxu1 %v2232_v55  ;;  %v334_v5 = vor.u32 %v333_v61, %v330_v56  ;;  %2040 = vmatprep.subr.bf16.mxu0 %v2246_v7 }
  0x45   : > { %v339_v6 = vrot.slane %v337_v62, 5  ;;  %v348_v8 = vor.u32 %v347_v1, %v344_v0  ;;  %v353_v9 = vrot.slane %v351_v2, 5  ;;  %v2614_v12 = vrot.slane %v394_v57, 4  ;;  %v584_v13 = vld [vmem:[#allocation2 + $0xd8] sm:$0xff]  ;;  %2080 = vmatprep.subr.bf16.mxu1 %v2247_v10  ;;  %v2248_v22 = vld [vmem:[%s2799_s1 + $0x108] sm:$0xff]   ;;  %v2250_v28 = vld [vmem:[%s2799_s1 + $0x140] sm:$0xff]  }
  0x46   : > { %v335_v14 = vrot.slane %v334_v5, 4  ;;  %v2618_v16 = vrot.slane %v408_v58, 4  ;;  %v450_v24 = vor.u32 %v449_v63, %v446_v51  ;;  %v464_v18 = vor.u32 %v463_v4, %v460_v3  ;;  %2041 = vmatpush3.bf16.msra.mxu0 %v2248_v22  ;;  %v2249_v26 = vld [vmem:[%s2799_s1 + $0x188] sm:$0xff]   ;;  %v2251_v30 = vld [vmem:[%s2799_s1 + $0x1c0] sm:$0xff]   ;;  %v201_v36 = vld [vmem:[%s2422_s28 + $0x94] sm:$0x1] }
  0x47   : > { %v589_v17 = vld [vmem:[#allocation2 + $0xfc] sm:$0xff]  ;;  %v349_v20 = vrot.slane %v348_v8, 4  ;;  %v2630_v27 = vrot.slane %v422_v11, 4  ;;  %v2635_v29 = vrot.slane %v436_v15, 4  ;;  %2081 = vmatpush3.bf16.msra.mxu1 %v2249_v26  ;;  %2042 = vmatprep.subr.bf16.mxu0 %v2250_v28  ;;  %v472_v34 = vshrl.u32 %v2599_v59, 16  ;;  %s1797_s19 = sshll.u32 %s2816_s17, 2 }
  0x48   : > { %v2241_v19 = vld [vmem:[#allocation2 + $0xdc] ss:$36 sps:$4 sm:$0xff]   ;;  %v340_v21 = vsel %vm2450_vm2, %v335_v14, %v339_v6  ;;  %v1826_v23 = vcombine.low %v584_v13, %v589_v17  ;;  %v2640_v31 = vrot.slane %v450_v24, 4  ;;  %v2645_v33 = vrot.slane %v464_v18, 4  ;;  %2082 = vmatprep.subr.bf16.mxu1 %v2251_v30  ;;  %v216_v38 = vld [vmem:[%s2422_s28 + $0xd8] sm:$0xf]  ;;  %s170_s21 = scalar_lea.vmem %s2801_s3, %s1797_s19 }
  0x49   : > { %1417 = vmatprep.mubr.bf16.mxu0 %v2241_v19  ;;  %v354_v25 = vsel %vm2450_vm2, %v349_v20, %v353_v9  ;;  %369 = vst [vmem:[#allocation2 + $0xe0] sm:$0xf] %v340_v21  ;;  %551 = vst [vmem:[#allocation2 + $0xd4] sm:$0xf] %v340_v21  ;;  %v2252_v32 = vld [vmem:[%s2799_s1 + $0x100] sm:$0xff]   ;;  %v475_v40 = vshll.u32 %v2599_v59, 16 }
  0x4a   : > { %370 = vst [vmem:[#allocation2 + $0x104] sm:$0xf] %v354_v25  ;;  %552 = vst [vmem:[#allocation2 + $0xf8] sm:$0xf] %v354_v25  ;;  %1418 = vmatmul.mubr.bf16.gmra.mxu0 %v1826_v23  ;;  %v2253_v35 = vld [vmem:[%s2799_s1 + $0x180] sm:$0xff]   ;;  %v486_v41 = vshrl.u32 %v2602_v60, 16 }
  0x4b   : > { %2043 = vmatpush3.bf16.msra.mxu0 %v2252_v32  ;;  %v203_v37 = vld [vmem:[%s2422_s28 + $0x9c] sm:$0x1]  ;;  %v217_v39 = vld [vmem:[%s2422_s28 + $0xe0] sm:$0xf]  ;;  %2083 = vmatpush3.bf16.msra.mxu1 %v2253_v35  ;;  %379 = vst [vmem:[#allocation2 + $0x10] sm:$0xf] %v216_v38 }
  0x4c   : > { %380 = vst [vmem:[#allocation2 + $0x34] sm:$0xf] %v217_v39  ;;  %v397_v43 = vshll.u32 %v201_v36, 16  ;;  %v411_v44 = vshll.u32 %v203_v37, 16  ;;  %v489_v42 = vshll.u32 %v2602_v60, 16  ;;  %v2260_v51 = vld [vmem:[%s2799_s1 + $0x238] sm:$0xff]  }
  0x4d   : > { %v2259_v46 = vld [vmem:[#allocation2 + $0x1c] ss:$36 sps:$4 sm:$0xff]   ;;  %v2243_v47 = vld [vmem:[#allocation2 + $0xe4] ss:$36 sps:$4 sm:$0xff]   ;;  %v474_v45 = vrot.slane %v472_v34, 4  ;;  %v477_v52 = vrot.slane %v475_v40, 5  ;;  %2120 = vmatprep.subr.bf16.mxu0 %v2260_v51  ;;  %2144 = vmatprep.subr.bf16.mxu1 %v2260_v51 }
  0x4e   : > { %v399_v49 = vrot.slane %v397_v43, 5  ;;  %v413_v50 = vrot.slane %v411_v44, 5  ;;  %1482 = vmatprep.mubr.bf16.mxu1 %v2243_v47  ;;  %v205_v55 = vld [vmem:[%s2422_s28 + $0xa4] sm:$0x1]  ;;  %v207_v57 = vld [vmem:[%s2422_s28 + $0xac] sm:$0x1] }
  0x4f   : > { %v218_v58 = vld [vmem:[%s2422_s28 + $0xe8] sm:$0xf]  ;;  %v219_v59 = vld [vmem:[%s2422_s28 + $0xf0] sm:$0xf]  ;;  %v488_v60 = vrot.slane %v486_v41, 4  ;;  %v491_v61 = vrot.slane %v489_v42, 5  ;;  %v478_v6 = vor.u32 %v477_v52, %v474_v45 }
  0x50   : > { %v400_v54 = vsel %vm2450_vm2, %v2614_v12, %v399_v49  ;;  %v414_v56 = vsel %vm2450_vm2, %v2618_v16, %v413_v50  ;;  %381 = vst [vmem:[#allocation2 + $0x58] sm:$0xf] %v218_v58  ;;  %382 = vst [vmem:[#allocation2 + $0x7c] sm:$0xf] %v219_v59  ;;  %v425_v62 = vshll.u32 %v205_v55, 16  ;;  %v439_v63 = vshll.u32 %v207_v57, 16 }
  0x51   : > { %v2245_v48 = vld [vmem:[#allocation2 + $0xe0] ss:$36 sps:$4 sm:$0xff]   ;;  %507 = vst [vmem:[#allocation2 + $0x14] sm:$0xf] %v400_v54  ;;  %508 = vst [vmem:[#allocation2 + $0x38] sm:$0xf] %v414_v56  ;;  %v492_v14 = vor.u32 %v491_v61, %v488_v60 }
  0x52   : > { %1483 = vmatmul.mubr.bf16.gmra.mxu1 %v2245_v48  ;;  %v2257_v0 = vld [vmem:[#allocation2 + $0x18] ss:$36 sps:$4 sm:$0xff]   ;;  %v427_v1 = vrot.slane %v425_v62, 5  ;;  %v441_v2 = vrot.slane %v439_v63, 5  ;;  %v2264_v3 = vld [vmem:[#allocation2 + $0x64] ss:$36 sps:$4 sm:$0xff]  }
  0x53   : > { %1588 = vmatprep.mubr.bf16.mxu1 %v2259_v46  ;;  %v209_v4 = vld [vmem:[%s2422_s28 + $0xb4] sm:$0x1]  ;;  %v211_v5 = vld [vmem:[%s2422_s28 + $0xbc] sm:$0x1]  ;;  %v220_v9 = vld [vmem:[%s2422_s28 + $0xf8] sm:$0xf] }
  0x54   : > { %v428_v7 = vsel %vm2450_vm2, %v2630_v27, %v427_v1  ;;  %v442_v8 = vsel %vm2450_vm2, %v2635_v29, %v441_v2  ;;  %v221_v10 = vld [vmem:[%s2422_s28 + $0x100] sm:$0xf]  ;;  %v453_v11 = vshll.u32 %v209_v4, 16  ;;  %v467_v12 = vshll.u32 %v211_v5, 16  ;;  %v2261_v13 = vld [vmem:[%s2799_s1 + $0x230] sm:$0xff]   ;;  %v2268_v23 = vld [vmem:[%s2799_s1 + $0x228] sm:$0xff]  }
  0x55   : > { %509 = vst [vmem:[#allocation2 + $0x5c] sm:$0xf] %v428_v7  ;;  %510 = vst [vmem:[#allocation2 + $0x80] sm:$0xf] %v442_v8  ;;  %v2254_v17 = vld [vmem:[#allocation2 + $0x10] ss:$36 sps:$4 sm:$0xff]  }
  0x56   : > { %383 = vst [vmem:[#allocation2 + $0xa0] sm:$0xf] %v220_v9  ;;  %384 = vst [vmem:[#allocation2 + $0xc4] sm:$0xf] %v221_v10  ;;  %v455_v15 = vrot.slane %v453_v11, 5  ;;  %v469_v16 = vrot.slane %v467_v12, 5 }
  0x57   : > { %v479_v20 = vrot.slane %v478_v6, 4  ;;  %v2267_v21 = vld [vmem:[#allocation2 + $0x60] ss:$36 sps:$4 sm:$0xff]   ;;  %v493_v25 = vrot.slane %v492_v14, 4  ;;  %v215_v26 = vld [vmem:[%s2422_s28 + $0xcc] sm:$0x1] }
  0x58   : > { %v2256_v19 = vld [vmem:[#allocation2 + $0x14] ss:$36 sps:$4 sm:$0xff]   ;;  %v456_v22 = vsel %vm2450_vm2, %v2640_v31, %v455_v15  ;;  %v470_v24 = vsel %vm2450_vm2, %v2645_v33, %v469_v16  ;;  %v213_v18 = vld [vmem:[%s2422_s28 + $0xc4] sm:$0x1]  ;;  %v222_v27 = vld [vmem:[%s2422_s28 + $0x108] sm:$0xf] }
  0x59   : > { %1523 = vmatprep.mubr.bf16.mxu0 %v2256_v19  ;;  %511 = vst [vmem:[#allocation2 + $0xa4] sm:$0xf] %v456_v22  ;;  %512 = vst [vmem:[#allocation2 + $0xc8] sm:$0xf] %v470_v24  ;;  %v223_v28 = vld [vmem:[%s2422_s28 + $0x110] sm:$0xf] }
  0x5a   : > { %1589 = vmatmul.mubr.bf16.vlgmr.msra.gmra.mxu1 %v2257_v0  ;;  %1524 = vmatmul.mubr.bf16.vlgmr.msra.gmra.mxu0 %v2254_v17  ;;  %v2272_v29 = vld [vmem:[#allocation2 + $0xac] ss:$36 sps:$4 sm:$0xff]   ;;  %385 = vst [vmem:[#allocation2 + $0xe8] sm:$0xf] %v222_v27  ;;  %386 = vst [vmem:[#allocation2 + $0x10c] sm:$0xf] %v223_v28 }
  0x5b   : > { %2152 = vmatpush3.bf16.msra.mxu1 %v2260_v51  ;;  %1596 = vmatprep.mubr.bf16.mxu1 %v2264_v3  ;;  %v481_v30 = vshll.u32 %v213_v18, 16  ;;  %v495_v31 = vshll.u32 %v215_v26, 16  ;;  %v189_v32 = vld [vmem:[%s2422_s28 + $0x40] sm:$0xf]  ;;  %v199_v33 = vld [vmem:[%s2422_s28 + $0x88] sm:$0xf] }
  0x5c   : > { %2145 = vmatprep.subr.bf16.mxu1 %v2261_v13  ;;  %2121 = vmatpush3.bf16.msra.mxu0 %v2260_v51  ;;  %v2262_v34 = vld [vmem:[#allocation2 + $0x5c] ss:$36 sps:$4 sm:$0xff]   ;;  %522 = vst [vmem:[#allocation2 + $0x114] sm:$0xf] %v189_v32  ;;  %530 = vst [vmem:[#allocation2 + $0x118] sm:$0xf] %v199_v33 }
  0x5d   : > { %2122 = vmatprep.subr.bf16.mxu0 %v2261_v13  ;;  %v532_v35 = vshrl.u32 %v189_v32, 16  ;;  %v535_v36 = vshll.u32 %v189_v32, 16  ;;  %v2266_v37 = vld [vmem:[#allocation2 + $0x58] ss:$36 sps:$4 sm:$0xff]   ;;  %v2269_v38 = vld [vmem:[%s2799_s1 + $0x220] sm:$0xff]   ;;  %v483_v39 = vrot.slane %v481_v30, 5  ;;  %1531 = vmatprep.mubr.bf16.mxu0 %v2262_v34 }
  0x5e   : > { %v497_v40 = vrot.slane %v495_v31, 5  ;;  %v2276_v47 = vld [vmem:[%s2799_s1 + $0x218] sm:$0xff]   ;;  %v2275_v49 = vld [vmem:[#allocation2 + $0xa8] ss:$36 sps:$4 sm:$0xff]   ;;  %v2277_v50 = vld [vmem:[%s2799_s1 + $0x210] sm:$0xff]  }
  0x5f   : > { %2153 = vmatpush3.bf16.msra.mxu1 %v2261_v13  ;;  %v534_v41 = vrot.slane %v532_v35, 4  ;;  %v537_v43 = vrot.slane %v535_v36, 5  ;;  %v484_v44 = vsel %vm2450_vm2, %v479_v20, %v483_v39  ;;  %v190_v45 = vld [vmem:[%s2422_s28 + $0x44] sm:$0x1]  ;;  %v2283_v58 = vld [vmem:[%s2799_s1 + $0x208] sm:$0xff]  }
  0x60   : > { %2146 = vmatprep.subr.bf16.mxu1 %v2268_v23  ;;  %2123 = vmatpush3.bf16.msra.mxu0 %v2261_v13  ;;  %v498_v42 = vsel %vm2450_vm2, %v493_v25, %v497_v40  ;;  %v2270_v46 = vld [vmem:[#allocation2 + $0xa4] ss:$36 sps:$4 sm:$0xff]   ;;  %513 = vst [vmem:[#allocation2 + $0xec] sm:$0xf] %v484_v44  ;;  %v541_v55 = vshll.u32 %v190_v45, 16 }
  0x61   : > { %2124 = vmatprep.subr.bf16.mxu0 %v2268_v23  ;;  %514 = vst [vmem:[#allocation2 + $0x110] sm:$0xf] %v498_v42  ;;  %v538_v48 = vor.u32 %v537_v43, %v534_v41  ;;  %v2274_v52 = vld [vmem:[#allocation2 + $0xa0] ss:$36 sps:$4 sm:$0xff]   ;;  %v2286_v0 = vld [vmem:[#allocation2 + $0xb0] ss:$36 sps:$4 sm:$0xff]  }
  0x62   : > { %1597 = vmatmul.mubr.bf16.gmra.mxu1 %v2267_v21  ;;  %1532 = vmatmul.mubr.bf16.gmra.mxu0 %v2266_v37  ;;  %v543_v57 = vrot.slane %v541_v55, 5  ;;  %v2284_v63 = vld [vmem:[%s2799_s1 + $0x200] sm:$0xff]   ;;  %v2287_v3 = vld [vmem:[#allocation2 + $0x68] ss:$36 sps:$4 sm:$0xff]  }
  0x63   : > { %2154 = vmatpush3.bf16.msra.mxu1 %v2268_v23  ;;  %1604 = vmatprep.mubr.bf16.mxu1 %v2272_v29  ;;  %v2280_v51 = vld [vmem:[#allocation2 + $0xf4] ss:$36 sps:$4 sm:$0xff]   ;;  %v539_v54 = vrot.slane %v538_v48, 4  ;;  %v2285_v2 = vld [vmem:[#allocation2 + $0x20] ss:$36 sps:$4 sm:$0xff]  }
  0x64   : > { %2147 = vmatprep.subr.bf16.mxu1 %v2269_v38  ;;  %2125 = vmatpush3.bf16.msra.mxu0 %v2268_v23  ;;  %v2282_v62 = vld [vmem:[#allocation2 + $0xf0] ss:$36 sps:$4 sm:$0xff]  }
  0x65   : > { %1539 = vmatprep.mubr.bf16.mxu0 %v2270_v46  ;;  %2126 = vmatprep.subr.bf16.mxu0 %v2269_v38  ;;  %v544_v59 = vsel %vm2450_vm2, %v539_v54, %v543_v57  ;;  %v1798_v57 = vld [vmem:[%s2800_s2] ss:$0 sm:$0xff] }
  0x66   : > { %553 = vst [vmem:[#allocation2 + $0x11c] sm:$0xf] %v544_v59 }
  0x67   : > { %2155 = vmatpush3.bf16.msra.mxu1 %v2269_v38  ;;  %v586_v60 = vld [vmem:[#allocation2 + $0xe8] sm:$0xff] }
  0x68   : > { %2148 = vmatprep.subr.bf16.mxu1 %v2276_v47  ;;  %2127 = vmatpush3.bf16.msra.mxu0 %v2269_v38  ;;  %v2278_v56 = vld [vmem:[#allocation2 + $0xec] ss:$36 sps:$4 sm:$0xff]  }
  0x69   : > { %2128 = vmatprep.subr.bf16.mxu0 %v2276_v47  ;;  %v591_v61 = vld [vmem:[#allocation2 + $0x10c] sm:$0xff] }
  0x6a   : > { %1605 = vmatmul.mubr.bf16.gmra.mxu1 %v2275_v49  ;;  %1540 = vmatmul.mubr.bf16.gmra.mxu0 %v2274_v52  ;;  %v1830_v1 = vcombine.low %v586_v60, %v591_v61 }
  0x6b   : > { %2156 = vmatpush3.bf16.msra.mxu1 %v2276_v47  ;;  %1612 = vmatprep.mubr.bf16.mxu1 %v2280_v51 }
  0x6c   : > { %2149 = vmatprep.subr.bf16.mxu1 %v2277_v50  ;;  %2129 = vmatpush3.bf16.msra.mxu0 %v2276_v47 }
  0x6d   : > { %1547 = vmatprep.mubr.bf16.mxu0 %v2278_v56  ;;  %2130 = vmatprep.subr.bf16.mxu0 %v2277_v50  ;;  %v2288_v53 = vld [vmem:[#allocation2 + $0xf8] ss:$36 sps:$4 sm:$0xff]  }
  0x6f   : > { %2157 = vmatpush3.bf16.msra.mxu1 %v2277_v50 }
  0x70   : > { %2150 = vmatprep.subr.bf16.mxu1 %v2283_v58  ;;  %2131 = vmatpush3.bf16.msra.mxu0 %v2277_v50 }
  0x71   : > { %2132 = vmatprep.subr.bf16.mxu0 %v2283_v58 }
  0x72   : > { %1613 = vmatmul.mubr.bf16.gmra.mxu1 %v2282_v62  ;;  %1548 = vmatmul.mubr.bf16.gmra.mxu0 %v1830_v1 }
  0x73   : > { %2158 = vmatpush3.bf16.msra.mxu1 %v2283_v58  ;;  %2140 = vmatprep.mubr.bf16.mxu1 %v2286_v0 }
  0x74   : > { %2151 = vmatprep.subr.bf16.mxu1 %v2284_v63  ;;  %2133 = vmatpush3.bf16.msra.mxu0 %v2283_v58 }
  0x75   : > { %2136 = vmatprep.mubr.bf16.mxu0 %v2285_v2  ;;  %2134 = vmatprep.subr.bf16.mxu0 %v2284_v63 }
  0x77   : > { %2159 = vmatpush3.bf16.msra.mxu1 %v2284_v63 }
  0x78   : > { %2135 = vmatpush3.bf16.msra.mxu0 %v2284_v63 }
  0x7a   : > { %2141 = vmatmul.mubr.bf16.vlgmr.msra.gmra.mxu1 %v2288_v53 }
  0x7b   : > { %2137 = vmatmul.mubr.bf16.vlgmr.msra.gmra.mxu0 %v2287_v3 }
  0xed   : > { %v1964_v4 = vpop.f32.mrf.mxu0 }
  0xee   : > { %v2004_v6 = vpop.f32.mrf.mxu1 }
  0xef   : > { %v1965_v5 = vpop.f32.mrf.mxu0 }
  0xf0   : > { %v2005_v8 = vpop.f32.mrf.mxu1  ;;  %v1966_v54 = vadd.f32 %v1965_v5, %v1964_v4 }
  0xf1   : > { %v1967_v7 = vpop.f32.mrf.mxu0 }
  0xf2   : > { %v2007_v10 = vpop.f32.mrf.mxu1  ;;  %v1396_v63 = vadd.f32 %v1966_v54, %v1798_v57 }
  0xf3   : > { %v1968_v9 = vpop.f32.mrf.mxu0 }
  0xf4   : > { %v2008_v12 = vpop.f32.mrf.mxu1  ;;  %v1969_v55 = vadd.f32 %v1968_v9, %v1967_v7 }
  0xf5   : > { %v1970_v11 = vpop.f32.mrf.mxu0  ;;  %v2009_v4 = vadd.f32 %v2008_v12, %v2007_v10 }
  0xf6   : > { %v2721_v14 = vpop.f32.mrf.mxu1  ;;  %v1399_v0 = vadd.f32 %v1969_v55, %v1798_v57 }
  0xf7   : > { %v1971_v13 = vpop.f32.mrf.mxu0 }
  0xf8   : > { %v2011_v16 = vpop.f32.mrf.mxu1  ;;  %v1972_v59 = vadd.f32 %v1971_v13, %v1970_v11  ;;  %v1464_v11 = vadd.f32 %v2009_v4, %v1399_v0 }
  0xf9   : > { %v1973_v15 = vpop.f32.mrf.mxu0  ;;  %v2012_v13 = vadd.f32 %v2011_v16, %v2721_v14 }
  0xfa   : > { %v2723_v19 = vpop.f32.mrf.mxu1  ;;  %v1404_v5 = vadd.f32 %v1972_v59, %v1798_v57 }
  0xfb   : > { %v1974_v17 = vpop.f32.mrf.mxu0 }
  0xfc   : > { %v2725_v22 = vpop.f32.mrf.mxu1  ;;  %v1975_v7 = vadd.f32 %v1974_v17, %v1973_v15 }
  0xfd   : > { %v1976_v20 = vpop.f32.mrf.mxu0  ;;  %v2015_v10 = vadd.f32 %v2725_v22, %v2723_v19 }
  0xff   : > { %v1977_v24 = vpop.f32.mrf.mxu0 }
 0x100   : > { %v1978_v61 = vadd.f32 %v1977_v24, %v1976_v20 }
 0x101   : > { %v1979_v23 = vpop.f32.mrf.mxu0 }
 0x103   : > { %v1980_v25 = vpop.f32.mrf.mxu0 }
 0x104   : > { %v2016_v21 = vpop.f32.mrf.mxu1  ;;  %v1981_v53 = vadd.f32 %v1980_v25, %v1979_v23 }
 0x106   : > { %v2017_v18 = vpop.f32.mrf.mxu1 }
 0x107   : > { %v2018_v54 = vadd.f32 %v2017_v18, %v2016_v21 }
 0x108   : > { %v2727_v26 = vpop.f32.mrf.mxu1 }
 0x10a   : > { %v1982_v27 = vpop.f32.mrf.mxu0  ;;  %v2729_v28 = vpop.f32.mrf.mxu1 }
 0x10c   : > { %v1983_v29 = vpop.f32.mrf.mxu0 }
 0x10d   : > { %v1984_v1 = vadd.f32 %v1983_v29, %v1982_v27  ;;  %v1415_v27 = vadd.f32 %v1981_v53, %v1798_v57 }
 0x10e   : > { %v1985_v32 = vpop.f32.mrf.mxu0 }
 0x10f   : > { %v1420_v20 = vadd.f32 %v1984_v1, %v1798_v57 }
 0x110   : > { %v1986_v35 = vpop.f32.mrf.mxu0 }
 0x112   : > { %v2022_v30 = vpop.f32.mrf.mxu1 }
 0x114   : > { %v2023_v31 = vpop.f32.mrf.mxu1 }
 0x115   : > { %v2024_v12 = vadd.f32 %v2023_v31, %v2022_v30 }
 0x116   : > { %v2731_v33 = vpop.f32.mrf.mxu1 }
 0x117   : > { %v1485_v21 = vadd.f32 %v2024_v12, %v1420_v20 }
 0x118   : > { %v2733_v34 = vpop.f32.mrf.mxu1 }
 0x119   : > { %v2027_v19 = vadd.f32 %v2733_v34, %v2731_v33 }
 0x11a   : > { %v2735_v36 = vpop.f32.mrf.mxu1  ;;  %v2044_v38 = vpop.f32.mrf.mxu0 }
 0x11c   : > { %v2737_v37 = vpop.f32.mrf.mxu1  ;;  %v2045_v40 = vpop.f32.mrf.mxu0 }
 0x11d   : > { %2804 = vst [vmem:[#allocation3_spill] sm:$0xff] %v2737_v37  ;;  %v2046_v18 = vadd.f32 %v2045_v40, %v2044_v38 }
 0x11e   : > { %v2739_v39 = vpop.f32.mrf.mxu1  ;;  %v2743_v43 = vpop.f32.mrf.mxu0 }
 0x11f   : > { %2805 = vst [vmem:[#allocation4_spill] sm:$0xff] %v2739_v39  ;;  %v1412_v39 = vadd.f32 %v1978_v61, %v1798_v57 }
 0x120   : > { %v2741_v41 = vpop.f32.mrf.mxu1  ;;  %v2747_v42 = vpop.f32.mrf.mxu0 }
 0x121   : > { %2806 = vst [vmem:[#allocation5_spill] sm:$0xff] %v2741_v41  ;;  %v2006_v41 = vadd.f32 %v2005_v8, %v2004_v6  ;;  %v1469_v6 = vadd.f32 %v2012_v13, %v1404_v5  ;;  %v1407_v8 = vadd.f32 %v1975_v7, %v1798_v57  ;;  %v1477_v17 = vadd.f32 %v2018_v54, %v1412_v39 }
 0x122   : > { %v2745_v44 = vpop.f32.mrf.mxu1  ;;  %v2050_v47 = vpop.f32.mrf.mxu0 }
 0x123   : > { %v1461_v37 = vadd.f32 %v2006_v41, %v1396_v63  ;;  %v1472_v39 = vadd.f32 %v2015_v10, %v1407_v8 }
 0x124   : > { %v2749_v46 = vpop.f32.mrf.mxu1  ;;  %v2051_v49 = vpop.f32.mrf.mxu0  ;;  %v2810_v59 = vld [vmem:[#allocation3_spill] sm:$0xff] }
 0x125   : > { %v2052_v29 = vadd.f32 %v2051_v49, %v2050_v47  ;;  %v2092_v40 = vadd.f32 %v2749_v46, %v2745_v44  ;;  %v2086_v61 = vadd.f32 %v2810_v59, %v2735_v36 }
 0x126   : > { %v2751_v48 = vpop.f32.mrf.mxu1  ;;  %v2053_v51 = vpop.f32.mrf.mxu0  ;;  %v2813_v4 = vld [vmem:[#allocation4_spill] sm:$0xff] }
 0x127   : > { %2807 = vst [vmem:[#allocation6_spill] sm:$0xff] %v2751_v48  ;;  %v1534_v22 = vadd.f32 %v2052_v29, %v1469_v6 }
 0x128   : > { %v2753_v50 = vpop.f32.mrf.mxu1  ;;  %v2054_v52 = vpop.f32.mrf.mxu0  ;;  %v2814_v5 = vld [vmem:[#allocation5_spill] sm:$0xff] }
 0x129   : > { %2808 = vst [vmem:[#allocation7_spill] sm:$0xff] %v2753_v50  ;;  %v1987_v50 = vadd.f32 %v1986_v35, %v1985_v32  ;;  %v2021_v32 = vadd.f32 %v2729_v28, %v2727_v26  ;;  %v2055_v41 = vadd.f32 %v2054_v52, %v2053_v51  ;;  %v2049_v26 = vadd.f32 %v2747_v42, %v2743_v43 }
 0x12a   : > { %v2755_v45 = vpop.f32.mrf.mxu1  ;;  %v2056_v58 = vpop.f32.mrf.mxu0  ;;  %v1526_v52 = vadd.f32 %v2046_v18, %v1461_v37  ;;  %v1599_v63 = vadd.f32 %v2092_v40, %v1534_v22  ;;  %v2089_v7 = vadd.f32 %v2814_v5, %v2813_v4 }
 0x12b   : > { %v1423_v14 = vadd.f32 %v1987_v50, %v1798_v57  ;;  %v1480_v55 = vadd.f32 %v2021_v32, %v1415_v27  ;;  %v1537_v43 = vadd.f32 %v2055_v41, %v1472_v39  ;;  %v1529_v44 = vadd.f32 %v2049_v26, %v1464_v11 }
 0x12c   : > { %v2097_v56 = vpop.f32.mrf.mxu1  ;;  %v2057_v62 = vpop.f32.mrf.mxu0  ;;  %v1591_v20 = vadd.f32 %v2086_v61, %v1526_v52 }
 0x12d   : > { %v2058_v23 = vadd.f32 %v2057_v62, %v2056_v58  ;;  %v1488_v38 = vadd.f32 %v2027_v19, %v1423_v14  ;;  %v2098_v33 = vadd.f32 %v2097_v56, %v2755_v45  ;;  %v1594_v8 = vadd.f32 %v2089_v7, %v1529_v44 }
 0x12e   : > { %v2760_v60 = vpop.f32.mrf.mxu1  ;;  %v2059_v3 = vpop.f32.mrf.mxu0  ;;  %v2811_v46 = vld [vmem:[#allocation6_spill] sm:$0xff] }
 0x12f   : > { %v1542_v30 = vadd.f32 %v2058_v23, %v1477_v17 }
 0x130   : > { %v2100_v2 = vpop.f32.mrf.mxu1  ;;  %v2060_v48 = vpop.f32.mrf.mxu0  ;;  %v2812_v45 = vld [vmem:[#allocation7_spill] sm:$0xff] }
 0x131   : > { %v2061_v16 = vadd.f32 %v2060_v48, %v2059_v3  ;;  %v2101_v62 = vadd.f32 %v2100_v2, %v2760_v60  ;;  %v1607_v1 = vadd.f32 %v2098_v33, %v1542_v30  ;;  %v2095_v56 = vadd.f32 %v2812_v45, %v2811_v46 }
 0x132   : > { %v2102_v9 = vpop.f32.mrf.mxu1  ;;  %v2062_v25 = vpop.f32.mrf.mxu0 }
 0x133   : > { %v1545_v34 = vadd.f32 %v2061_v16, %v1480_v55 }
 0x134   : > { %v2103_v24 = vpop.f32.mrf.mxu1  ;;  %v2063_v35 = vpop.f32.mrf.mxu0 }
 0x135   : > { %v2064_v47 = vadd.f32 %v2063_v35, %v2062_v25  ;;  %v2104_v48 = vadd.f32 %v2103_v24, %v2102_v9  ;;  %v1610_v60 = vadd.f32 %v2101_v62, %v1545_v34  ;;  %v1602_v24 = vadd.f32 %v2095_v56, %v1537_v43 }
 0x136   : > { %v2105_v15 = vpop.f32.mrf.mxu1  ;;  %v2065_v31 = vpop.f32.mrf.mxu0 }
 0x137   : > { %v1550_v28 = vadd.f32 %v2064_v47, %v1485_v21 }
 0x138   : > { %v2106_v49 = vpop.f32.mrf.mxu1  ;;  %v2066_v51 = vpop.f32.mrf.mxu0 }
 0x139   : > { %v2067_v42 = vadd.f32 %v2066_v51, %v2065_v31  ;;  %v1615_v57 = vadd.f32 %v2104_v48, %v1550_v28  ;;  %v2107_v3 = vadd.f32 %v2106_v49, %v2105_v15 }
 0x13a   : > { %v2142_v50 = vpop.f32.mrf.mxu1 }
 0x13b   : > { %v2138_v0 = vpop.f32.mrf.mxu0  ;;  %v1553_v53 = vadd.f32 %v2067_v42, %v1488_v38  ;;  %v1680_v2 = vadd.f32 %v2142_v50, %v1615_v57 }
 0x13c   : > { %v1671_v58 = vpop.f32.mrf.mxu1  ;;  %v1664_v9 = vadd.f32 %v2138_v0, %v1599_v63 }
 0x13d   : > { %v1655_v36 = vpop.f32.mrf.mxu0  ;;  %v1672_v13 = vadd.f32 %v1671_v58, %v1607_v1  ;;  %v1618_v11 = vadd.f32 %v2107_v3, %v1553_v53  ;;  %v1692_v32 = vmax.f32 %v1680_v2, 0.0 }
 0x13e   : > { %v2143_v37 = vpop.f32.mrf.mxu1  ;;  %v1656_v23 = vadd.f32 %v1655_v36, %v1591_v20  ;;  %v1688_v10 = vmax.f32 %v1664_v9, 0.0 }
 0x13f   : > { %v2139_v27 = vpop.f32.mrf.mxu0  ;;  %v1683_v6 = vadd.f32 %v2143_v37, %v1618_v11  ;;  %v1690_v12 = vmax.f32 %v1672_v13, 0.0 }
 0x140   : > { %v1674_v54 = vpop.f32.mrf.mxu1  ;;  %v1667_v25 = vadd.f32 %v2139_v27, %v1602_v24  ;;  %v1686_v18 = vmax.f32 %v1656_v23, 0.0 }
 0x141   : > { %v1675_v29 = vadd.f32 %v1674_v54, %v1610_v60  ;;  %v1658_v15 = vpop.f32.mrf.mxu0  ;;  %v1693_v16 = vmax.f32 %v1683_v6, 0.0 }
 0x142   : > { %v1689_v14 = vmax.f32 %v1667_v25, 0.0  ;;  %v1659_v35 = vadd.f32 %v1658_v15, %v1594_v8 }
 0x143   : > { %v1691_v17 = vmax.f32 %v1675_v29, 0.0  ;;  %v1943_v47 = vpack.c.bf16 %v1693_v16, %v1692_v32 }
 0x144   : > { %v1933_v41 = vpack.c.bf16 %v1689_v14, %v1688_v10  ;;  %v1687_v49 = vmax.f32 %v1659_v35, 0.0 }
 0x145   : > { %v1938_v21 = vpack.c.bf16 %v1691_v17, %v1690_v12  ;;  %1947 = vst [vmem:[%s170_s21 + $0x18] sm:$0xff] %v1943_v47  }
 0x146   : > { %1945 = vst [vmem:[%s170_s21 + $0x8] sm:$0xff] %v1933_v41   ;;  %v1928_v55 = vpack.c.bf16 %v1687_v49, %v1686_v18 }
 0x147   : > { %1946 = vst [vmem:[%s170_s21 + $0x10] sm:$0xff] %v1938_v21  }
 0x148   : > { %1929 = vst [vmem:[%s170_s21] sm:$0xff] %v1928_v55  }
 0x149 PF: > { %s13_s12 = sadd.s32 1, %s2295_s12  }
 0x14a   : > { %p10_p5 = scmp.ge.s32.totalorder %s13_s12, 4  }
 0x14c   :  { %12 = sbr.rel (!%p10_p5) target bundleno = 1 (0x1), region = 62 }

</bundles_post_ra>
